<compile_context>
chip_gen: v5e
topology: v5e:2x2
jax: 0.10.0
libtpu: 0.0.40
codegen_flags: <defaults>
</compile_context>

<pallas_src>
import numpy as np

import jax
import jax.numpy as jnp
from jax.experimental import pallas as pl
from jax.experimental.pallas import tpu as pltpu


# ---------------------------------------------------------------------------
# Host-side (one-time) weight preprocessing
# ---------------------------------------------------------------------------
def _conv_band(w, W):
    """w: [Cout, Cin, K, K] -> R: [K, Cin*W, Cout*Wo] banded matrices with
    R[i, c*W + xo + j, o*Wo + xo] = w[o, c, i, j]  (Wo = W - K + 1).

    Then   conv[y, o*Wo+xo] = sum_i ( X[y+i, :] @ R[i] )[o*Wo+xo]
    where X is the stage input laid out as [H, Cin*W] (lane = c*W + x)."""
    Cout, Cin, K, _ = w.shape
    Wo = W - K + 1
    R = np.zeros((K, Cin * W, Cout * Wo), np.float32)
    d = np.arange(Wo)
    for i in range(K):
        for c in range(Cin):
            for o in range(Cout):
                for j in range(K):
                    R[i, c * W + d + j, o * Wo + d] = w[o, c, i, j]
    return R


def _pool_row(Ho):
    """[2, Hp, Ho] 0/1 matrices selecting even / odd output rows."""
    Hp = Ho // 2
    P = np.zeros((2, Hp, Ho), np.float32)
    idx = np.arange(Hp)
    P[0, idx, 2 * idx] = 1.0
    P[1, idx, 2 * idx + 1] = 1.0
    return P


def _pool_col(C, Wo):
    """[2, C*Wo, C*Wp] 0/1 matrices selecting even / odd columns per channel
    block of the (o, x) lane layout."""
    Wp = Wo // 2
    P = np.zeros((2, C * Wo, C * Wp), np.float32)
    xp = np.arange(Wp)
    for o in range(C):
        P[0, o * Wo + 2 * xp, o * Wp + xp] = 1.0
        P[1, o * Wo + 2 * xp + 1, o * Wp + xp] = 1.0
    return P


_PREP_ORDER = ["r1", "pb1", "prow1", "pcol1",
               "r2", "pb2", "prow2", "pcol2",
               "w1r", "fb1", "w2", "fb2", "w3", "fb3"]


def prepare_params(params):
    """Derive the kernel's resident operands from Net's parameters (host)."""
    c1w = np.asarray(params["conv1_w"]); c1b = np.asarray(params["conv1_b"])
    c2w = np.asarray(params["conv2_w"]); c2b = np.asarray(params["conv2_b"])
    f1w = np.asarray(params["fc1_w"]);   f1b = np.asarray(params["fc1_b"])
    f2w = np.asarray(params["fc2_w"]);   f2b = np.asarray(params["fc2_b"])
    f3w = np.asarray(params["fc3_w"]);   f3b = np.asarray(params["fc3_b"])

    # fc1 rows are ordered (c, y, x) by torch.flatten; our conv2 output is
    # laid out [y, (c, x)] -> permute fc1 rows once on the host.
    w1r = f1w.reshape(16, 5, 5, 120).transpose(1, 0, 2, 3).reshape(5, 80, 120)

    prep = {
        "r1":    _conv_band(c1w, 32),            # [5, 96, 168]
        "pb1":   np.repeat(c1b, 14)[None, :],    # [1, 84]   bias per (o, xp) lane
        "prow1": _pool_row(28),                  # [2, 14, 28]
        "pcol1": _pool_col(6, 28),               # [2, 168, 84]
        "r2":    _conv_band(c2w, 14),            # [5, 84, 160]
        "pb2":   np.repeat(c2b, 5)[None, :],     # [1, 80]
        "prow2": _pool_row(10),                  # [2, 5, 10]
        "pcol2": _pool_col(16, 10),              # [2, 160, 80]
        "w1r":   w1r,                            # [5, 80, 120]
        "fb1":   f1b[None, :],                   # [1, 120]
        "w2":    f2w,                            # [120, 84]
        "fb2":   f2b[None, :],                   # [1, 84]
        "w3":    f3w,                            # [84, 10]
        "fb3":   f3b[None, :],                   # [1, 10]
    }
    return {k: jnp.asarray(v, jnp.float32) for k, v in prep.items()}


# ---------------------------------------------------------------------------
# The fused Pallas kernel (entire forward pass)
# ---------------------------------------------------------------------------
def _net_kernel(x_ref, r1_ref, pb1_ref, prow1_ref, pcol1_ref,
                r2_ref, pb2_ref, prow2_ref, pcol2_ref,
                w1r_ref, fb1_ref, w2_ref, fb2_ref, w3_ref, fb3_ref,
                o_ref):
    TB = x_ref.shape[0]
    K = 5

    # Hoist all VMEM-resident weight loads out of the per-image loop.
    r1 = [r1_ref[i] for i in range(K)]
    r2 = [r2_ref[i] for i in range(K)]
    prow1 = (prow1_ref[0], prow1_ref[1]); pcol1 = (pcol1_ref[0], pcol1_ref[1])
    prow2 = (prow2_ref[0], prow2_ref[1]); pcol2 = (pcol2_ref[0], pcol2_ref[1])
    pb1 = pb1_ref[...]; pb2 = pb2_ref[...]
    w1r = [w1r_ref[y] for y in range(K)]
    fb1 = fb1_ref[...]; w2 = w2_ref[...]; fb2 = fb2_ref[...]
    w3 = w3_ref[...]; fb3 = fb3_ref[...]

    def conv_stage(xb, r, prow, pcol, pb, ho):
        # xb: [H, Cin*W]; 5 banded matmuls == valid 5x5 conv at all Ho rows.
        y = jnp.dot(xb[0:ho, :], r[0], preferred_element_type=jnp.float32)
        for i in range(1, K):
            y = y + jnp.dot(xb[i:i + ho, :], r[i],
                            preferred_element_type=jnp.float32)
        # 2x2/s2 max-pool: row selection matmuls, then lane selection matmuls.
        yr = jnp.maximum(
            jnp.dot(prow[0], y, preferred_element_type=jnp.float32),
            jnp.dot(prow[1], y, preferred_element_type=jnp.float32))
        yp = jnp.maximum(
            jnp.dot(yr, pcol[0], preferred_element_type=jnp.float32),
            jnp.dot(yr, pcol[1], preferred_element_type=jnp.float32))
        # relu(maxpool(conv) + b) == maxpool(relu(conv + b))
        return jnp.maximum(yp + pb, 0.0)

    rows = []
    for b in range(TB):
        xb = x_ref[b]                                          # [32, 96]
        a1 = conv_stage(xb, r1, prow1, pcol1, pb1, 28)         # [14, 84]
        a2 = conv_stage(a1, r2, prow2, pcol2, pb2, 10)         # [5, 80]
        # fc1 as 5 accumulating matmuls (avoids an in-kernel flatten).
        h = jnp.dot(a2[0:1, :], w1r[0], preferred_element_type=jnp.float32)
        for y in range(1, K):
            h = h + jnp.dot(a2[y:y + 1, :], w1r[y],
                            preferred_element_type=jnp.float32)
        h = jnp.maximum(h + fb1, 0.0)                          # [1, 120]
        h = jnp.maximum(
            jnp.dot(h, w2, preferred_element_type=jnp.float32) + fb2, 0.0)
        rows.append(jnp.dot(h, w3, preferred_element_type=jnp.float32) + fb3)
    o_ref[0] = jnp.concatenate(rows, axis=0)                   # [TB, 10]


# ---------------------------------------------------------------------------
# Wrapper
# ---------------------------------------------------------------------------
def net_forward(prep, x):
    """x: [N, 3, 32, 32] NCHW float32 -> logits [N, 10]."""
    N = x.shape[0]
    # Stage-input layout: [N, H, Cin*W]  (lane = c*W + x) -- single cheap
    # transpose/reshape in glue; everything else happens inside one kernel.
    xm = jnp.transpose(x, (0, 2, 1, 3)).reshape(N, 32, 3 * 32)

    TB = 8 if N >= 16 else 1            # >=2 grid steps at small batch (v7x)
    nb = pl.cdiv(N, TB)
    Npad = nb * TB
    if Npad != N:
        xm = jnp.pad(xm, ((0, Npad - N), (0, 0), (0, 0)))

    def resident(arr):
        return pl.BlockSpec(arr.shape, lambda i, nd=arr.ndim: (0,) * nd)

    operands = [prep[k] for k in _PREP_ORDER]
    out = pl.pallas_call(
        _net_kernel,
        out_shape=jax.ShapeDtypeStruct((nb, TB, 10), jnp.float32),
        grid=(nb,),
        in_specs=[pl.BlockSpec((TB, 32, 96), lambda i: (i, 0, 0))]
        + [resident(a) for a in operands],
        out_specs=pl.BlockSpec((1, TB, 10), lambda i: (i, 0, 0)),
        compiler_params=pltpu.CompilerParams(
            dimension_semantics=("parallel",),
            vmem_limit_bytes=32 * 1024 * 1024,
        ),
    )(xm, *operands)
    return out.reshape(Npad, 10)[:N]


# ---------------------------------------------------------------------------
# Parameters & pure-JAX reference (validation only)
# ---------------------------------------------------------------------------
def init_params(key):
    ks = jax.random.split(key, 10)

    def w(k, shape, fan_in):
        return jax.random.normal(k, shape, jnp.float32) * (1.0 / fan_in) ** 0.5

    return {
        "conv1_w": w(ks[0], (6, 3, 5, 5), 3 * 5 * 5),
        "conv1_b": w(ks[1], (6,), 3 * 5 * 5),
        "conv2_w": w(ks[2], (16, 6, 5, 5), 6 * 5 * 5),
        "conv2_b": w(ks[3], (16,), 6 * 5 * 5),
        # fc weights stored as [in, out] (transposed vs PyTorch's [out, in])
        "fc1_w": w(ks[4], (16 * 5 * 5, 120), 16 * 5 * 5),
        "fc1_b": w(ks[5], (120,), 16 * 5 * 5),
        "fc2_w": w(ks[6], (120, 84), 120),
        "fc2_b": w(ks[7], (84,), 120),
        "fc3_w": w(ks[8], (84, 10), 84),
        "fc3_b": w(ks[9], (10,), 84),
    }


def net_reference(params, x):
    dn = ("NCHW", "OIHW", "NCHW")
    y = jax.lax.conv_general_dilated(x, params["conv1_w"], (1, 1), "VALID",
                                     dimension_numbers=dn)
    y = jax.nn.relu(y + params["conv1_b"][None, :, None, None])
    y = jax.lax.reduce_window(y, -jnp.inf, jax.lax.max,
                              (1, 1, 2, 2), (1, 1, 2, 2), "VALID")
    y = jax.lax.conv_general_dilated(y, params["conv2_w"], (1, 1), "VALID",
                                     dimension_numbers=dn)
    y = jax.nn.relu(y + params["conv2_b"][None, :, None, None])
    y = jax.lax.reduce_window(y, -jnp.inf, jax.lax.max,
                              (1, 1, 2, 2), (1, 1, 2, 2), "VALID")
    y = y.reshape(y.shape[0], -1)
    y = jax.nn.relu(y @ params["fc1_w"] + params["fc1_b"])
    y = jax.nn.relu(y @ params["fc2_w"] + params["fc2_b"])
    return y @ params["fc3_w"] + params["fc3_b"]


if __name__ == "__main__":
    key = jax.random.PRNGKey(0)
    k_param, k_x = jax.random.split(key)
    params = init_params(k_param)
    prep = prepare_params(params)

    # Spatial size 32 / 3 channels are forced by fc1 expecting 16*5*5 features.
    x = jax.random.normal(k_x, (2, 3, 32, 32), jnp.float32)

    out = jax.block_until_ready(jax.jit(net_forward)(prep, x))
    assert out.shape == (2, 10) and out.dtype == jnp.float32

    ref = jax.block_until_ready(jax.jit(net_reference)(params, x))
    err = float(jnp.max(jnp.abs(out - ref)))
    assert err < 5e-3, f"mismatch vs reference: {err}"
    print("KERNEL_OK")
</pallas_src>

<mosaic_0001>
module attributes {stable_mosaic.version = 11 : i64} {
  func.func @_net_kernel(%arg0: i32, %arg1: memref<1x32x96xf32, #tpu.memory_space<vmem>>, %arg2: memref<5x96x168xf32, #tpu.memory_space<vmem>>, %arg3: memref<1x84xf32, #tpu.memory_space<vmem>>, %arg4: memref<2x14x28xf32, #tpu.memory_space<vmem>>, %arg5: memref<2x168x84xf32, #tpu.memory_space<vmem>>, %arg6: memref<5x84x160xf32, #tpu.memory_space<vmem>>, %arg7: memref<1x80xf32, #tpu.memory_space<vmem>>, %arg8: memref<2x5x10xf32, #tpu.memory_space<vmem>>, %arg9: memref<2x160x80xf32, #tpu.memory_space<vmem>>, %arg10: memref<5x80x120xf32, #tpu.memory_space<vmem>>, %arg11: memref<1x120xf32, #tpu.memory_space<vmem>>, %arg12: memref<120x84xf32, #tpu.memory_space<vmem>>, %arg13: memref<1x84xf32, #tpu.memory_space<vmem>>, %arg14: memref<84x10xf32, #tpu.memory_space<vmem>>, %arg15: memref<1x10xf32, #tpu.memory_space<vmem>>, %arg16: memref<1x1x10xf32, #tpu.memory_space<vmem>>) attributes {dimension_semantics = [#tpu.dimension_semantics<parallel>], iteration_bounds = array<i64: 2>, scalar_prefetch = 0 : i64, scratch_operands = 0 : i64, tpu.core_type = #tpu.core_type<tc>, window_params = [{transform_indices = @transform_0, window_bounds = array<i64: 1, 32, 96>}, {pipeline_mode = #tpu.pipeline_mode<synchronous>, transform_indices = @transform_1, window_bounds = array<i64: 5, 96, 168>}, {pipeline_mode = #tpu.pipeline_mode<synchronous>, transform_indices = @transform_2, window_bounds = array<i64: 1, 84>}, {pipeline_mode = #tpu.pipeline_mode<synchronous>, transform_indices = @transform_3, window_bounds = array<i64: 2, 14, 28>}, {pipeline_mode = #tpu.pipeline_mode<synchronous>, transform_indices = @transform_4, window_bounds = array<i64: 2, 168, 84>}, {pipeline_mode = #tpu.pipeline_mode<synchronous>, transform_indices = @transform_5, window_bounds = array<i64: 5, 84, 160>}, {pipeline_mode = #tpu.pipeline_mode<synchronous>, transform_indices = @transform_6, window_bounds = array<i64: 1, 80>}, {pipeline_mode = #tpu.pipeline_mode<synchronous>, transform_indices = @transform_7, window_bounds = array<i64: 2, 5, 10>}, {pipeline_mode = #tpu.pipeline_mode<synchronous>, transform_indices = @transform_8, window_bounds = array<i64: 2, 160, 80>}, {pipeline_mode = #tpu.pipeline_mode<synchronous>, transform_indices = @transform_9, window_bounds = array<i64: 5, 80, 120>}, {pipeline_mode = #tpu.pipeline_mode<synchronous>, transform_indices = @transform_10, window_bounds = array<i64: 1, 120>}, {pipeline_mode = #tpu.pipeline_mode<synchronous>, transform_indices = @transform_11, window_bounds = array<i64: 120, 84>}, {pipeline_mode = #tpu.pipeline_mode<synchronous>, transform_indices = @transform_12, window_bounds = array<i64: 1, 84>}, {pipeline_mode = #tpu.pipeline_mode<synchronous>, transform_indices = @transform_13, window_bounds = array<i64: 84, 10>}, {pipeline_mode = #tpu.pipeline_mode<synchronous>, transform_indices = @transform_14, window_bounds = array<i64: 1, 10>}, {transform_indices = @transform_15, window_bounds = array<i64: 1, 1, 10>}]} {
    %c0 = arith.constant 0 : index
    %c0_0 = arith.constant 0 : index
    %c0_1 = arith.constant 0 : index
    %0 = vector.load %arg2[%c0, %c0_0, %c0_1] : memref<5x96x168xf32, #tpu.memory_space<vmem>>, vector<1x96x168xf32>
    %1 = vector.shape_cast %0 : vector<1x96x168xf32> to vector<96x168xf32>
    %c1 = arith.constant 1 : index
    %c0_2 = arith.constant 0 : index
    %c0_3 = arith.constant 0 : index
    %2 = vector.load %arg2[%c1, %c0_2, %c0_3] : memref<5x96x168xf32, #tpu.memory_space<vmem>>, vector<1x96x168xf32>
    %3 = vector.shape_cast %2 : vector<1x96x168xf32> to vector<96x168xf32>
    %c2 = arith.constant 2 : index
    %c0_4 = arith.constant 0 : index
    %c0_5 = arith.constant 0 : index
    %4 = vector.load %arg2[%c2, %c0_4, %c0_5] : memref<5x96x168xf32, #tpu.memory_space<vmem>>, vector<1x96x168xf32>
    %5 = vector.shape_cast %4 : vector<1x96x168xf32> to vector<96x168xf32>
    %c3 = arith.constant 3 : index
    %c0_6 = arith.constant 0 : index
    %c0_7 = arith.constant 0 : index
    %6 = vector.load %arg2[%c3, %c0_6, %c0_7] : memref<5x96x168xf32, #tpu.memory_space<vmem>>, vector<1x96x168xf32>
    %7 = vector.shape_cast %6 : vector<1x96x168xf32> to vector<96x168xf32>
    %c4 = arith.constant 4 : index
    %c0_8 = arith.constant 0 : index
    %c0_9 = arith.constant 0 : index
    %8 = vector.load %arg2[%c4, %c0_8, %c0_9] : memref<5x96x168xf32, #tpu.memory_space<vmem>>, vector<1x96x168xf32>
    %9 = vector.shape_cast %8 : vector<1x96x168xf32> to vector<96x168xf32>
    %c0_10 = arith.constant 0 : index
    %c0_11 = arith.constant 0 : index
    %c0_12 = arith.constant 0 : index
    %10 = vector.load %arg6[%c0_10, %c0_11, %c0_12] : memref<5x84x160xf32, #tpu.memory_space<vmem>>, vector<1x84x160xf32>
    %11 = vector.shape_cast %10 : vector<1x84x160xf32> to vector<84x160xf32>
    %c1_13 = arith.constant 1 : index
    %c0_14 = arith.constant 0 : index
    %c0_15 = arith.constant 0 : index
    %12 = vector.load %arg6[%c1_13, %c0_14, %c0_15] : memref<5x84x160xf32, #tpu.memory_space<vmem>>, vector<1x84x160xf32>
    %13 = vector.shape_cast %12 : vector<1x84x160xf32> to vector<84x160xf32>
    %c2_16 = arith.constant 2 : index
    %c0_17 = arith.constant 0 : index
    %c0_18 = arith.constant 0 : index
    %14 = vector.load %arg6[%c2_16, %c0_17, %c0_18] : memref<5x84x160xf32, #tpu.memory_space<vmem>>, vector<1x84x160xf32>
    %15 = vector.shape_cast %14 : vector<1x84x160xf32> to vector<84x160xf32>
    %c3_19 = arith.constant 3 : index
    %c0_20 = arith.constant 0 : index
    %c0_21 = arith.constant 0 : index
    %16 = vector.load %arg6[%c3_19, %c0_20, %c0_21] : memref<5x84x160xf32, #tpu.memory_space<vmem>>, vector<1x84x160xf32>
    %17 = vector.shape_cast %16 : vector<1x84x160xf32> to vector<84x160xf32>
    %c4_22 = arith.constant 4 : index
    %c0_23 = arith.constant 0 : index
    %c0_24 = arith.constant 0 : index
    %18 = vector.load %arg6[%c4_22, %c0_23, %c0_24] : memref<5x84x160xf32, #tpu.memory_space<vmem>>, vector<1x84x160xf32>
    %19 = vector.shape_cast %18 : vector<1x84x160xf32> to vector<84x160xf32>
    %c0_25 = arith.constant 0 : index
    %c0_26 = arith.constant 0 : index
    %c0_27 = arith.constant 0 : index
    %20 = vector.load %arg4[%c0_25, %c0_26, %c0_27] : memref<2x14x28xf32, #tpu.memory_space<vmem>>, vector<1x14x28xf32>
    %21 = vector.shape_cast %20 : vector<1x14x28xf32> to vector<14x28xf32>
    %c1_28 = arith.constant 1 : index
    %c0_29 = arith.constant 0 : index
    %c0_30 = arith.constant 0 : index
    %22 = vector.load %arg4[%c1_28, %c0_29, %c0_30] : memref<2x14x28xf32, #tpu.memory_space<vmem>>, vector<1x14x28xf32>
    %23 = vector.shape_cast %22 : vector<1x14x28xf32> to vector<14x28xf32>
    %c0_31 = arith.constant 0 : index
    %c0_32 = arith.constant 0 : index
    %c0_33 = arith.constant 0 : index
    %24 = vector.load %arg5[%c0_31, %c0_32, %c0_33] : memref<2x168x84xf32, #tpu.memory_space<vmem>>, vector<1x168x84xf32>
    %25 = vector.shape_cast %24 : vector<1x168x84xf32> to vector<168x84xf32>
    %c1_34 = arith.constant 1 : index
    %c0_35 = arith.constant 0 : index
    %c0_36 = arith.constant 0 : index
    %26 = vector.load %arg5[%c1_34, %c0_35, %c0_36] : memref<2x168x84xf32, #tpu.memory_space<vmem>>, vector<1x168x84xf32>
    %27 = vector.shape_cast %26 : vector<1x168x84xf32> to vector<168x84xf32>
    %c0_37 = arith.constant 0 : index
    %c0_38 = arith.constant 0 : index
    %c0_39 = arith.constant 0 : index
    %28 = vector.load %arg8[%c0_37, %c0_38, %c0_39] : memref<2x5x10xf32, #tpu.memory_space<vmem>>, vector<1x5x10xf32>
    %29 = vector.shape_cast %28 : vector<1x5x10xf32> to vector<5x10xf32>
    %c1_40 = arith.constant 1 : index
    %c0_41 = arith.constant 0 : index
    %c0_42 = arith.constant 0 : index
    %30 = vector.load %arg8[%c1_40, %c0_41, %c0_42] : memref<2x5x10xf32, #tpu.memory_space<vmem>>, vector<1x5x10xf32>
    %31 = vector.shape_cast %30 : vector<1x5x10xf32> to vector<5x10xf32>
    %c0_43 = arith.constant 0 : index
    %c0_44 = arith.constant 0 : index
    %c0_45 = arith.constant 0 : index
    %32 = vector.load %arg9[%c0_43, %c0_44, %c0_45] : memref<2x160x80xf32, #tpu.memory_space<vmem>>, vector<1x160x80xf32>
    %33 = vector.shape_cast %32 : vector<1x160x80xf32> to vector<160x80xf32>
    %c1_46 = arith.constant 1 : index
    %c0_47 = arith.constant 0 : index
    %c0_48 = arith.constant 0 : index
    %34 = vector.load %arg9[%c1_46, %c0_47, %c0_48] : memref<2x160x80xf32, #tpu.memory_space<vmem>>, vector<1x160x80xf32>
    %35 = vector.shape_cast %34 : vector<1x160x80xf32> to vector<160x80xf32>
    %c0_49 = arith.constant 0 : index
    %c0_50 = arith.constant 0 : index
    %36 = vector.load %arg3[%c0_49, %c0_50] : memref<1x84xf32, #tpu.memory_space<vmem>>, vector<1x84xf32>
    %c0_51 = arith.constant 0 : index
    %c0_52 = arith.constant 0 : index
    %37 = vector.load %arg7[%c0_51, %c0_52] : memref<1x80xf32, #tpu.memory_space<vmem>>, vector<1x80xf32>
    %c0_53 = arith.constant 0 : index
    %c0_54 = arith.constant 0 : index
    %c0_55 = arith.constant 0 : index
    %38 = vector.load %arg10[%c0_53, %c0_54, %c0_55] : memref<5x80x120xf32, #tpu.memory_space<vmem>>, vector<1x80x120xf32>
    %39 = vector.shape_cast %38 : vector<1x80x120xf32> to vector<80x120xf32>
    %c1_56 = arith.constant 1 : index
    %c0_57 = arith.constant 0 : index
    %c0_58 = arith.constant 0 : index
    %40 = vector.load %arg10[%c1_56, %c0_57, %c0_58] : memref<5x80x120xf32, #tpu.memory_space<vmem>>, vector<1x80x120xf32>
    %41 = vector.shape_cast %40 : vector<1x80x120xf32> to vector<80x120xf32>
    %c2_59 = arith.constant 2 : index
    %c0_60 = arith.constant 0 : index
    %c0_61 = arith.constant 0 : index
    %42 = vector.load %arg10[%c2_59, %c0_60, %c0_61] : memref<5x80x120xf32, #tpu.memory_space<vmem>>, vector<1x80x120xf32>
    %43 = vector.shape_cast %42 : vector<1x80x120xf32> to vector<80x120xf32>
    %c3_62 = arith.constant 3 : index
    %c0_63 = arith.constant 0 : index
    %c0_64 = arith.constant 0 : index
    %44 = vector.load %arg10[%c3_62, %c0_63, %c0_64] : memref<5x80x120xf32, #tpu.memory_space<vmem>>, vector<1x80x120xf32>
    %45 = vector.shape_cast %44 : vector<1x80x120xf32> to vector<80x120xf32>
    %c4_65 = arith.constant 4 : index
    %c0_66 = arith.constant 0 : index
    %c0_67 = arith.constant 0 : index
    %46 = vector.load %arg10[%c4_65, %c0_66, %c0_67] : memref<5x80x120xf32, #tpu.memory_space<vmem>>, vector<1x80x120xf32>
    %47 = vector.shape_cast %46 : vector<1x80x120xf32> to vector<80x120xf32>
    %c0_68 = arith.constant 0 : index
    %c0_69 = arith.constant 0 : index
    %48 = vector.load %arg11[%c0_68, %c0_69] : memref<1x120xf32, #tpu.memory_space<vmem>>, vector<1x120xf32>
    %c0_70 = arith.constant 0 : index
    %c0_71 = arith.constant 0 : index
    %49 = vector.load %arg12[%c0_70, %c0_71] : memref<120x84xf32, #tpu.memory_space<vmem>>, vector<120x84xf32>
    %c0_72 = arith.constant 0 : index
    %c0_73 = arith.constant 0 : index
    %50 = vector.load %arg13[%c0_72, %c0_73] : memref<1x84xf32, #tpu.memory_space<vmem>>, vector<1x84xf32>
    %c0_74 = arith.constant 0 : index
    %c0_75 = arith.constant 0 : index
    %51 = vector.load %arg14[%c0_74, %c0_75] : memref<84x10xf32, #tpu.memory_space<vmem>>, vector<84x10xf32>
    %c0_76 = arith.constant 0 : index
    %c0_77 = arith.constant 0 : index
    %52 = vector.load %arg15[%c0_76, %c0_77] : memref<1x10xf32, #tpu.memory_space<vmem>>, vector<1x10xf32>
    %c0_78 = arith.constant 0 : index
    %c0_79 = arith.constant 0 : index
    %c0_80 = arith.constant 0 : index
    %53 = vector.load %arg1[%c0_78, %c0_79, %c0_80] : memref<1x32x96xf32, #tpu.memory_space<vmem>>, vector<1x32x96xf32>
    %54 = vector.shape_cast %53 : vector<1x32x96xf32> to vector<32x96xf32>
    %55 = vector.extract_strided_slice %54 {offsets = [0, 0], sizes = [28, 96], strides = [1, 1]} : vector<32x96xf32> to vector<28x96xf32>
    %cst = arith.constant dense<0.000000e+00> : vector<28x168xf32>
    %56 = tpu.matmul %55, %1, %cst {dimension_numbers = #tpu.dot_dimension_numbers<[1], [0], [0], [1], [0, 0, 1, 1], [], []>} : vector<28x96xf32>, vector<96x168xf32>, vector<28x168xf32> -> vector<28x168xf32>
    %57 = vector.extract_strided_slice %54 {offsets = [1, 0], sizes = [28, 96], strides = [1, 1]} : vector<32x96xf32> to vector<28x96xf32>
    %cst_81 = arith.constant dense<0.000000e+00> : vector<28x168xf32>
    %58 = tpu.matmul %57, %3, %cst_81 {dimension_numbers = #tpu.dot_dimension_numbers<[1], [0], [0], [1], [0, 0, 1, 1], [], []>} : vector<28x96xf32>, vector<96x168xf32>, vector<28x168xf32> -> vector<28x168xf32>
    %59 = arith.addf %56, %58 : vector<28x168xf32>
    %60 = vector.extract_strided_slice %54 {offsets = [2, 0], sizes = [28, 96], strides = [1, 1]} : vector<32x96xf32> to vector<28x96xf32>
    %cst_82 = arith.constant dense<0.000000e+00> : vector<28x168xf32>
    %61 = tpu.matmul %60, %5, %cst_82 {dimension_numbers = #tpu.dot_dimension_numbers<[1], [0], [0], [1], [0, 0, 1, 1], [], []>} : vector<28x96xf32>, vector<96x168xf32>, vector<28x168xf32> -> vector<28x168xf32>
    %62 = arith.addf %59, %61 : vector<28x168xf32>
    %63 = vector.extract_strided_slice %54 {offsets = [3, 0], sizes = [28, 96], strides = [1, 1]} : vector<32x96xf32> to vector<28x96xf32>
    %cst_83 = arith.constant dense<0.000000e+00> : vector<28x168xf32>
    %64 = tpu.matmul %63, %7, %cst_83 {dimension_numbers = #tpu.dot_dimension_numbers<[1], [0], [0], [1], [0, 0, 1, 1], [], []>} : vector<28x96xf32>, vector<96x168xf32>, vector<28x168xf32> -> vector<28x168xf32>
    %65 = arith.addf %62, %64 : vector<28x168xf32>
    %66 = vector.extract_strided_slice %54 {offsets = [4, 0], sizes = [28, 96], strides = [1, 1]} : vector<32x96xf32> to vector<28x96xf32>
    %cst_84 = arith.constant dense<0.000000e+00> : vector<28x168xf32>
    %67 = tpu.matmul %66, %9, %cst_84 {dimension_numbers = #tpu.dot_dimension_numbers<[1], [0], [0], [1], [0, 0, 1, 1], [], []>} : vector<28x96xf32>, vector<96x168xf32>, vector<28x168xf32> -> vector<28x168xf32>
    %68 = arith.addf %65, %67 : vector<28x168xf32>
    %cst_85 = arith.constant dense<0.000000e+00> : vector<14x168xf32>
    %69 = tpu.matmul %21, %68, %cst_85 {dimension_numbers = #tpu.dot_dimension_numbers<[1], [0], [0], [1], [0, 0, 1, 1], [], []>} : vector<14x28xf32>, vector<28x168xf32>, vector<14x168xf32> -> vector<14x168xf32>
    %cst_86 = arith.constant dense<0.000000e+00> : vector<14x168xf32>
    %70 = tpu.matmul %23, %68, %cst_86 {dimension_numbers = #tpu.dot_dimension_numbers<[1], [0], [0], [1], [0, 0, 1, 1], [], []>} : vector<14x28xf32>, vector<28x168xf32>, vector<14x168xf32> -> vector<14x168xf32>
    %71 = arith.maximumf %69, %70 : vector<14x168xf32>
    %cst_87 = arith.constant dense<0.000000e+00> : vector<14x84xf32>
    %72 = tpu.matmul %71, %25, %cst_87 {dimension_numbers = #tpu.dot_dimension_numbers<[1], [0], [0], [1], [0, 0, 1, 1], [], []>} : vector<14x168xf32>, vector<168x84xf32>, vector<14x84xf32> -> vector<14x84xf32>
    %cst_88 = arith.constant dense<0.000000e+00> : vector<14x84xf32>
    %73 = tpu.matmul %71, %27, %cst_88 {dimension_numbers = #tpu.dot_dimension_numbers<[1], [0], [0], [1], [0, 0, 1, 1], [], []>} : vector<14x168xf32>, vector<168x84xf32>, vector<14x84xf32> -> vector<14x84xf32>
    %74 = arith.maximumf %72, %73 : vector<14x84xf32>
    %75 = vector.broadcast %36 : vector<1x84xf32> to vector<14x84xf32>
    %76 = arith.addf %74, %75 : vector<14x84xf32>
    %cst_89 = arith.constant 0.000000e+00 : f32
    %77 = vector.broadcast %cst_89 : f32 to vector<14x84xf32>
    %78 = arith.maximumf %76, %77 : vector<14x84xf32>
    %79 = vector.extract_strided_slice %78 {offsets = [0, 0], sizes = [10, 84], strides = [1, 1]} : vector<14x84xf32> to vector<10x84xf32>
    %cst_90 = arith.constant dense<0.000000e+00> : vector<10x160xf32>
    %80 = tpu.matmul %79, %11, %cst_90 {dimension_numbers = #tpu.dot_dimension_numbers<[1], [0], [0], [1], [0, 0, 1, 1], [], []>} : vector<10x84xf32>, vector<84x160xf32>, vector<10x160xf32> -> vector<10x160xf32>
    %81 = vector.extract_strided_slice %78 {offsets = [1, 0], sizes = [10, 84], strides = [1, 1]} : vector<14x84xf32> to vector<10x84xf32>
    %cst_91 = arith.constant dense<0.000000e+00> : vector<10x160xf32>
    %82 = tpu.matmul %81, %13, %cst_91 {dimension_numbers = #tpu.dot_dimension_numbers<[1], [0], [0], [1], [0, 0, 1, 1], [], []>} : vector<10x84xf32>, vector<84x160xf32>, vector<10x160xf32> -> vector<10x160xf32>
    %83 = arith.addf %80, %82 : vector<10x160xf32>
    %84 = vector.extract_strided_slice %78 {offsets = [2, 0], sizes = [10, 84], strides = [1, 1]} : vector<14x84xf32> to vector<10x84xf32>
    %cst_92 = arith.constant dense<0.000000e+00> : vector<10x160xf32>
    %85 = tpu.matmul %84, %15, %cst_92 {dimension_numbers = #tpu.dot_dimension_numbers<[1], [0], [0], [1], [0, 0, 1, 1], [], []>} : vector<10x84xf32>, vector<84x160xf32>, vector<10x160xf32> -> vector<10x160xf32>
    %86 = arith.addf %83, %85 : vector<10x160xf32>
    %87 = vector.extract_strided_slice %78 {offsets = [3, 0], sizes = [10, 84], strides = [1, 1]} : vector<14x84xf32> to vector<10x84xf32>
    %cst_93 = arith.constant dense<0.000000e+00> : vector<10x160xf32>
    %88 = tpu.matmul %87, %17, %cst_93 {dimension_numbers = #tpu.dot_dimension_numbers<[1], [0], [0], [1], [0, 0, 1, 1], [], []>} : vector<10x84xf32>, vector<84x160xf32>, vector<10x160xf32> -> vector<10x160xf32>
    %89 = arith.addf %86, %88 : vector<10x160xf32>
    %90 = vector.extract_strided_slice %78 {offsets = [4, 0], sizes = [10, 84], strides = [1, 1]} : vector<14x84xf32> to vector<10x84xf32>
    %cst_94 = arith.constant dense<0.000000e+00> : vector<10x160xf32>
    %91 = tpu.matmul %90, %19, %cst_94 {dimension_numbers = #tpu.dot_dimension_numbers<[1], [0], [0], [1], [0, 0, 1, 1], [], []>} : vector<10x84xf32>, vector<84x160xf32>, vector<10x160xf32> -> vector<10x160xf32>
    %92 = arith.addf %89, %91 : vector<10x160xf32>
    %cst_95 = arith.constant dense<0.000000e+00> : vector<5x160xf32>
    %93 = tpu.matmul %29, %92, %cst_95 {dimension_numbers = #tpu.dot_dimension_numbers<[1], [0], [0], [1], [0, 0, 1, 1], [], []>} : vector<5x10xf32>, vector<10x160xf32>, vector<5x160xf32> -> vector<5x160xf32>
    %cst_96 = arith.constant dense<0.000000e+00> : vector<5x160xf32>
    %94 = tpu.matmul %31, %92, %cst_96 {dimension_numbers = #tpu.dot_dimension_numbers<[1], [0], [0], [1], [0, 0, 1, 1], [], []>} : vector<5x10xf32>, vector<10x160xf32>, vector<5x160xf32> -> vector<5x160xf32>
    %95 = arith.maximumf %93, %94 : vector<5x160xf32>
    %cst_97 = arith.constant dense<0.000000e+00> : vector<5x80xf32>
    %96 = tpu.matmul %95, %33, %cst_97 {dimension_numbers = #tpu.dot_dimension_numbers<[1], [0], [0], [1], [0, 0, 1, 1], [], []>} : vector<5x160xf32>, vector<160x80xf32>, vector<5x80xf32> -> vector<5x80xf32>
    %cst_98 = arith.constant dense<0.000000e+00> : vector<5x80xf32>
    %97 = tpu.matmul %95, %35, %cst_98 {dimension_numbers = #tpu.dot_dimension_numbers<[1], [0], [0], [1], [0, 0, 1, 1], [], []>} : vector<5x160xf32>, vector<160x80xf32>, vector<5x80xf32> -> vector<5x80xf32>
    %98 = arith.maximumf %96, %97 : vector<5x80xf32>
    %99 = vector.broadcast %37 : vector<1x80xf32> to vector<5x80xf32>
    %100 = arith.addf %98, %99 : vector<5x80xf32>
    %cst_99 = arith.constant 0.000000e+00 : f32
    %101 = vector.broadcast %cst_99 : f32 to vector<5x80xf32>
    %102 = arith.maximumf %100, %101 : vector<5x80xf32>
    %103 = vector.extract_strided_slice %102 {offsets = [0, 0], sizes = [1, 80], strides = [1, 1]} : vector<5x80xf32> to vector<1x80xf32>
    %cst_100 = arith.constant dense<0.000000e+00> : vector<1x120xf32>
    %104 = tpu.matmul %103, %39, %cst_100 {dimension_numbers = #tpu.dot_dimension_numbers<[1], [0], [0], [1], [0, 0, 1, 1], [], []>} : vector<1x80xf32>, vector<80x120xf32>, vector<1x120xf32> -> vector<1x120xf32>
    %105 = vector.extract_strided_slice %102 {offsets = [1, 0], sizes = [1, 80], strides = [1, 1]} : vector<5x80xf32> to vector<1x80xf32>
    %cst_101 = arith.constant dense<0.000000e+00> : vector<1x120xf32>
    %106 = tpu.matmul %105, %41, %cst_101 {dimension_numbers = #tpu.dot_dimension_numbers<[1], [0], [0], [1], [0, 0, 1, 1], [], []>} : vector<1x80xf32>, vector<80x120xf32>, vector<1x120xf32> -> vector<1x120xf32>
    %107 = arith.addf %104, %106 : vector<1x120xf32>
    %108 = vector.extract_strided_slice %102 {offsets = [2, 0], sizes = [1, 80], strides = [1, 1]} : vector<5x80xf32> to vector<1x80xf32>
    %cst_102 = arith.constant dense<0.000000e+00> : vector<1x120xf32>
    %109 = tpu.matmul %108, %43, %cst_102 {dimension_numbers = #tpu.dot_dimension_numbers<[1], [0], [0], [1], [0, 0, 1, 1], [], []>} : vector<1x80xf32>, vector<80x120xf32>, vector<1x120xf32> -> vector<1x120xf32>
    %110 = arith.addf %107, %109 : vector<1x120xf32>
    %111 = vector.extract_strided_slice %102 {offsets = [3, 0], sizes = [1, 80], strides = [1, 1]} : vector<5x80xf32> to vector<1x80xf32>
    %cst_103 = arith.constant dense<0.000000e+00> : vector<1x120xf32>
    %112 = tpu.matmul %111, %45, %cst_103 {dimension_numbers = #tpu.dot_dimension_numbers<[1], [0], [0], [1], [0, 0, 1, 1], [], []>} : vector<1x80xf32>, vector<80x120xf32>, vector<1x120xf32> -> vector<1x120xf32>
    %113 = arith.addf %110, %112 : vector<1x120xf32>
    %114 = vector.extract_strided_slice %102 {offsets = [4, 0], sizes = [1, 80], strides = [1, 1]} : vector<5x80xf32> to vector<1x80xf32>
    %cst_104 = arith.constant dense<0.000000e+00> : vector<1x120xf32>
    %115 = tpu.matmul %114, %47, %cst_104 {dimension_numbers = #tpu.dot_dimension_numbers<[1], [0], [0], [1], [0, 0, 1, 1], [], []>} : vector<1x80xf32>, vector<80x120xf32>, vector<1x120xf32> -> vector<1x120xf32>
    %116 = arith.addf %113, %115 : vector<1x120xf32>
    %117 = arith.addf %116, %48 : vector<1x120xf32>
    %cst_105 = arith.constant 0.000000e+00 : f32
    %118 = vector.broadcast %cst_105 : f32 to vector<1x120xf32>
    %119 = arith.maximumf %117, %118 : vector<1x120xf32>
    %cst_106 = arith.constant dense<0.000000e+00> : vector<1x84xf32>
    %120 = tpu.matmul %119, %49, %cst_106 {dimension_numbers = #tpu.dot_dimension_numbers<[1], [0], [0], [1], [0, 0, 1, 1], [], []>} : vector<1x120xf32>, vector<120x84xf32>, vector<1x84xf32> -> vector<1x84xf32>
    %121 = arith.addf %120, %50 : vector<1x84xf32>
    %cst_107 = arith.constant 0.000000e+00 : f32
    %122 = vector.broadcast %cst_107 : f32 to vector<1x84xf32>
    %123 = arith.maximumf %121, %122 : vector<1x84xf32>
    %cst_108 = arith.constant dense<0.000000e+00> : vector<1x10xf32>
    %124 = tpu.matmul %123, %51, %cst_108 {dimension_numbers = #tpu.dot_dimension_numbers<[1], [0], [0], [1], [0, 0, 1, 1], [], []>} : vector<1x84xf32>, vector<84x10xf32>, vector<1x10xf32> -> vector<1x10xf32>
    %125 = arith.addf %124, %52 : vector<1x10xf32>
    %c0_109 = arith.constant 0 : index
    %c0_110 = arith.constant 0 : index
    %c0_111 = arith.constant 0 : index
    %126 = vector.load %arg16[%c0_109, %c0_110, %c0_111] : memref<1x1x10xf32, #tpu.memory_space<vmem>>, vector<1x1x10xf32>
    %127 = vector.shape_cast %126 : vector<1x1x10xf32> to vector<1x10xf32>
    %128 = vector.shape_cast %125 : vector<1x10xf32> to vector<1x1x10xf32>
    tpu.vector_store %arg16[%c0_109, %c0_110, %c0_111], %128 {strides = array<i32>} : memref<1x1x10xf32, #tpu.memory_space<vmem>>, vector<1x1x10xf32>,
    return
  }
  func.func @transform_0(%arg0: i32) -> (i32, i32, i32) {
    %c0_i32 = arith.constant 0 : i32
    %c0_i32_0 = arith.constant 0 : i32
    %c0_i32_1 = arith.constant 0 : i32
    return %arg0, %c0_i32, %c0_i32_0 : i32, i32, i32
  }
  func.func @transform_1(%arg0: i32) -> (i32, i32, i32) {
    %c0_i32 = arith.constant 0 : i32
    %c0_i32_0 = arith.constant 0 : i32
    %c0_i32_1 = arith.constant 0 : i32
    %c0_i32_2 = arith.constant 0 : i32
    return %c0_i32, %c0_i32_0, %c0_i32_1 : i32, i32, i32
  }
  func.func @transform_2(%arg0: i32) -> (i32, i32) {
    %c0_i32 = arith.constant 0 : i32
    %c0_i32_0 = arith.constant 0 : i32
    %c0_i32_1 = arith.constant 0 : i32
    return %c0_i32, %c0_i32_0 : i32, i32
  }
  func.func @transform_3(%arg0: i32) -> (i32, i32, i32) {
    %c0_i32 = arith.constant 0 : i32
    %c0_i32_0 = arith.constant 0 : i32
    %c0_i32_1 = arith.constant 0 : i32
    %c0_i32_2 = arith.constant 0 : i32
    return %c0_i32, %c0_i32_0, %c0_i32_1 : i32, i32, i32
  }
  func.func @transform_4(%arg0: i32) -> (i32, i32, i32) {
    %c0_i32 = arith.constant 0 : i32
    %c0_i32_0 = arith.constant 0 : i32
    %c0_i32_1 = arith.constant 0 : i32
    %c0_i32_2 = arith.constant 0 : i32
    return %c0_i32, %c0_i32_0, %c0_i32_1 : i32, i32, i32
  }
  func.func @transform_5(%arg0: i32) -> (i32, i32, i32) {
    %c0_i32 = arith.constant 0 : i32
    %c0_i32_0 = arith.constant 0 : i32
    %c0_i32_1 = arith.constant 0 : i32
    %c0_i32_2 = arith.constant 0 : i32
    return %c0_i32, %c0_i32_0, %c0_i32_1 : i32, i32, i32
  }
  func.func @transform_6(%arg0: i32) -> (i32, i32) {
    %c0_i32 = arith.constant 0 : i32
    %c0_i32_0 = arith.constant 0 : i32
    %c0_i32_1 = arith.constant 0 : i32
    return %c0_i32, %c0_i32_0 : i32, i32
  }
  func.func @transform_7(%arg0: i32) -> (i32, i32, i32) {
    %c0_i32 = arith.constant 0 : i32
    %c0_i32_0 = arith.constant 0 : i32
    %c0_i32_1 = arith.constant 0 : i32
    %c0_i32_2 = arith.constant 0 : i32
    return %c0_i32, %c0_i32_0, %c0_i32_1 : i32, i32, i32
  }
  func.func @transform_8(%arg0: i32) -> (i32, i32, i32) {
    %c0_i32 = arith.constant 0 : i32
    %c0_i32_0 = arith.constant 0 : i32
    %c0_i32_1 = arith.constant 0 : i32
    %c0_i32_2 = arith.constant 0 : i32
    return %c0_i32, %c0_i32_0, %c0_i32_1 : i32, i32, i32
  }
  func.func @transform_9(%arg0: i32) -> (i32, i32, i32) {
    %c0_i32 = arith.constant 0 : i32
    %c0_i32_0 = arith.constant 0 : i32
    %c0_i32_1 = arith.constant 0 : i32
    %c0_i32_2 = arith.constant 0 : i32
    return %c0_i32, %c0_i32_0, %c0_i32_1 : i32, i32, i32
  }
  func.func @transform_10(%arg0: i32) -> (i32, i32) {
    %c0_i32 = arith.constant 0 : i32
    %c0_i32_0 = arith.constant 0 : i32
    %c0_i32_1 = arith.constant 0 : i32
    return %c0_i32, %c0_i32_0 : i32, i32
  }
  func.func @transform_11(%arg0: i32) -> (i32, i32) {
    %c0_i32 = arith.constant 0 : i32
    %c0_i32_0 = arith.constant 0 : i32
    %c0_i32_1 = arith.constant 0 : i32
    return %c0_i32, %c0_i32_0 : i32, i32
  }
  func.func @transform_12(%arg0: i32) -> (i32, i32) {
    %c0_i32 = arith.constant 0 : i32
    %c0_i32_0 = arith.constant 0 : i32
    %c0_i32_1 = arith.constant 0 : i32
    return %c0_i32, %c0_i32_0 : i32, i32
  }
  func.func @transform_13(%arg0: i32) -> (i32, i32) {
    %c0_i32 = arith.constant 0 : i32
    %c0_i32_0 = arith.constant 0 : i32
    %c0_i32_1 = arith.constant 0 : i32
    return %c0_i32, %c0_i32_0 : i32, i32
  }
  func.func @transform_14(%arg0: i32) -> (i32, i32) {
    %c0_i32 = arith.constant 0 : i32
    %c0_i32_0 = arith.constant 0 : i32
    %c0_i32_1 = arith.constant 0 : i32
    return %c0_i32, %c0_i32_0 : i32, i32
  }
  func.func @transform_15(%arg0: i32) -> (i32, i32, i32) {
    %c0_i32 = arith.constant 0 : i32
    %c0_i32_0 = arith.constant 0 : i32
    %c0_i32_1 = arith.constant 0 : i32
    return %arg0, %c0_i32, %c0_i32_0 : i32, i32, i32
  }
}

</mosaic_0001>

<bundles_post_ra>
// kernel: net_forward.1
= control target key start
LH: loop header
LB: loop body
LE: loop exit
PB: predicated region body
PF: predicated region fallthrough
CT: control target
= control target key end

     0   :  { %s4283_s0 = inlined_call_operand.vmem [shape: f32[2,32,96], index: 0, kind: input, shape index: {}]   ;;  %s4284_s1 = inlined_call_operand.vmem [shape: f32[5,96,168], index: 1, kind: input, shape index: {}]   ;;  %s4285_s2 = inlined_call_operand.vmem [shape: f32[1,84], index: 2, kind: input, shape index: {}]   ;;  %s4286_s3 = inlined_call_operand.vmem [shape: f32[2,14,28], index: 3, kind: input, shape index: {}]   ;;  %s4287_s4 = inlined_call_operand.vmem [shape: f32[2,168,84], index: 4, kind: input, shape index: {}]   ;;  %s4288_s5 = inlined_call_operand.vmem [shape: f32[5,84,160], index: 5, kind: input, shape index: {}]   ;;  %s4289_s6 = inlined_call_operand.vmem [shape: f32[1,80], index: 6, kind: input, shape index: {}]   ;;  %s4290_s7 = inlined_call_operand.vmem [shape: f32[2,5,10], index: 7, kind: input, shape index: {}]   ;;  %s4291_s8 = inlined_call_operand.vmem [shape: f32[2,160,80], index: 8, kind: input, shape index: {}]   ;;  %s4292_s9 = inlined_call_operand.vmem [shape: f32[5,80,120], index: 9, kind: input, shape index: {}]   ;;  %s4293_s10 = inlined_call_operand.vmem [shape: f32[1,120], index: 10, kind: input, shape index: {}]   ;;  %s4294_s11 = inlined_call_operand.vmem [shape: f32[120,84], index: 11, kind: input, shape index: {}]   ;;  %s4295_s12 = inlined_call_operand.vmem [shape: f32[1,84], index: 12, kind: input, shape index: {}]   ;;  %s4296_s13 = inlined_call_operand.vmem [shape: f32[84,10], index: 13, kind: input, shape index: {}]   ;;  %s4297_s14 = inlined_call_operand.vmem [shape: f32[1,10], index: 14, kind: input, shape index: {}]   ;;  %s4298_s15 = inlined_call_operand.hbm [shape: f32[2,1,10], index: 15, kind: output, shape index: {}]  }
   0x1   :  { %4305 = sst [smem:[#allocation11_spill]] %s4283_s0 }
   0x2   :  { %20 = vsyncpa [#allocation3], 0 }
   0x3   :  { %22 = vsyncpa [#allocation3 + $0x1], 0  ;;  %s2826_s18 = smov 0   ;;  %s2828_s19 = smov 0  }
   0x4   :  { %s2830_s20 = smov 0   ;;  %s2832_s21 = smov 0  }
   0x5 LB: > { %4306 = sst [smem:[#allocation5_spill]] %s2732_s18  ;;  %s2847_s22 = sadd.s32 4294967295, %s2744_s21   ;;  %s2744_s21 = sphi %s2832_s21, %s4318_s21   ;;  %s2740_s20 = sphi %s2830_s20, %s4320_s20   ;;  %s2736_s19 = sphi %s2828_s19, %s4322_s19   ;;  %s2732_s18 = sphi %s2826_s18, %s4321_s18  }
   0x6   : > { %4307 = sst [smem:[#allocation6_spill]] %s2740_s20  ;;  %s2260_s23 = sadd.s32 4294967294, %s2744_s21  }
   0x7   : > { %4308 = sst [smem:[#allocation7_spill]] %s2744_s21  ;;  %s2851_s24 = sadd.s32 1, %s2744_s21  }
   0x8   : > { %4309 = sst [smem:[#allocation8_spill]] %s2851_s24  ;;  %s355_s25 = sadd.s32 1, %s2740_s20 }
   0x9   : > { %s352_s26 = ssub.s32 %s2744_s21, %s2851_s24  ;;  %p365_p0 = scmp.ne.s32.totalorder %s2740_s20, %s2736_s19 }
   0xa   : > { %p353_p1 = scmp.eq.s32.totalorder %s352_s26, 0  ;;  %p366_p2 = scmp.eq.s32.totalorder %s2847_s22, 1 }
   0xb   : > { %p371_p3 = scmp.ne.s32.totalorder %s2736_s19, %s2732_s18  ;;  %p372_p4 = scmp.eq.s32.totalorder %s2260_s23, 1 }
   0xc   : > { %s2862_s27 = scalar_select %p353_p1, %s2740_s20, %s355_s25  }
   0xd   : > { %p2864_p5 = por %p366_p2, %p365_p0  ;;  %p2868_p6 = por %p372_p4, %p371_p3 }
   0xe   : > { %4310 = sst [smem:[#allocation9_spill]] %s2862_s27  ;;  %p2263_p7 = scmp.ge.s32.totalorder %s2744_s21, 1 }
   0xf   : > { %s4312_s29 = scalar_select %p2868_p6, 1, 0 }
  0x10   : > { %p440_p8 = scmp.lt.s32.totalorder %s2744_s21, 3 }
  0x11   : > { %4313 = sst [smem:[#allocation10_spill]] %s4312_s29 }
  0x12   : > { %p441_p9 = pnand %p2263_p7, %p440_p8 }
  0x13   : > { %p487_p10 = scmp.lt.s32.totalorder (!%p441_p9), %s2847_s22, 1  ;;  %s4314_s0 = sld [smem:[#allocation11_spill]] (!%p441_p9) }
  0x14   : > { %444 = sbr.rel (%p441_p9) target bundleno = 1458 (0x5b2), region = 80  ;;  %s485_s17 = sand.u32 (!%p441_p9), 1, %s2736_s19  }
  0x15   : > { %s2201_s25 = scalar_lea.hbm (!%p441_p9), %s4298_s15, %s2847_s22  ;;  %s486_s27 = scalar_lea.vmem (!%p441_p9), [#allocation2], %s485_s17 }
  0x16   : > { %s2203_s24 = sshll.u32 (!%p441_p9), %s486_s27, 4  ;;  %s2205_s29 = sshll.u32 (!%p441_p9), %s2201_s25, 4  ;;  %s2204_s24 = int_to_ptr.vmem [resolvable:$true] %s2203_s24  ;;  %s2206_s29 = int_to_ptr.hbm [resolvable:$true] %s2205_s29 }
  0x17   : > { %s2193_s30 = scalar_lea.sflag (!%p441_p9), [#allocation3], %s485_s17  ;;  %s2696_s16 = sshra.s32 (!%p441_p9), %s2206_s29, 4  ;;  %s2697_s16 = int_to_ptr.hbm [resolvable:$true] %s2696_s16 }
  0x18   : > { %p2703_p0 = scmp.lt.s32.totalorder (!%p441_p9), %s2697_s16, %s4298_s15 }
  0x19   : > { %v2288_v0 = vld [vmem:[%s4284_s1 + $0x170] sm:$0xff]  ;;  %v2289_v1 = vld [vmem:[%s4284_s1 + $0x178] sm:$0xff]  ;;  %v2286_v4 = vld [vmem:[%s4284_s1 + $0x160] sm:$0xff]  ;;  %s2932_s20 = scalar_select %p487_p10, %s2847_s22, 1  ;;  %vm915_vm0 = vcmask 1046528   ;;  %vm923_vm1 = vcmask 785408  }
  0x1a   : > { %v514_v2 = vld [vmem:[%s4284_s1 + $0xb0] sm:$0xff]  ;;  %936 = vmatpush.msra.mxu0 %v2288_v0  ;;  %965 = vmatpush.msra.mxu1 %v2289_v1  ;;  %v515_v3 = vld [vmem:[%s4284_s1 + $0xb8] sm:$0xff]  ;;  %v2287_v5 = vld [vmem:[%s4284_s1 + $0x168] sm:$0xff]  ;;  %vm1056_vm2 = vcmask 1045504   ;;  %vm1138_vm3 = vcmask 1044480   ;;  %vm1220_vm4 = vcmask 1043456  }
  0x1b   : > { %1002 = vmatpush.msra.mxu2 %v514_v2  ;;  %1031 = vmatpush.msra.mxu3 %v515_v3  ;;  %v512_v6 = vld [vmem:[%s4284_s1 + $0xa0] sm:$0xff]  ;;  %v513_v7 = vld [vmem:[%s4284_s1 + $0xa8] sm:$0xff]  ;;  %v2284_v8 = vld [vmem:[%s4284_s1 + $0x150] sm:$0xff]  ;;  %s2640_s23 = sshll.u32 %s2932_s20, 5  ;;  %vm1302_vm5 = vcmask 228352   ;;  %vm1417_vm6 = vcmask 326656  }
  0x1c   : > { %937 = vmatpush.msra.mxu0 %v2286_v4  ;;  %966 = vmatpush.msra.mxu1 %v2287_v5  ;;  %v2285_v9 = vld [vmem:[%s4284_s1 + $0x158] sm:$0xff]  ;;  %v510_v10 = vld [vmem:[%s4284_s1 + $0x90] sm:$0xff]  ;;  %v2282_v12 = vld [vmem:[%s4284_s1 + $0x140] sm:$0xff]  ;;  %s2980_s21 = scalar_lea.vmem %s4314_s0, %s2640_s23  ;;  %vm1530_vm7 = vcmask 687104   ;;  %vm1836_vm8 = vcmask 1041408   ;;  %vm1832_vm9 = vcmask 80896  }
  0x1d   : > { %v511_v11 = vld [vmem:[%s4284_s1 + $0x98] sm:$0xff]  ;;  %1003 = vmatpush.msra.mxu2 %v512_v6  ;;  %1032 = vmatpush.msra.mxu3 %v513_v7  ;;  %v2283_v13 = vld [vmem:[%s4284_s1 + $0x148] sm:$0xff]  ;;  %v508_v14 = vld [vmem:[%s4284_s1 + $0x80] sm:$0xff]  ;;  %vm1928_vm10 = vcmask 261120   ;;  %vm2020_vm11 = vcmask 654336   ;;  %vm2139_vm12 = vcmask 982016  }
  0x1e   : > { %938 = vmatpush.msra.mxu0 %v2284_v8  ;;  %967 = vmatpush.msra.mxu1 %v2285_v9  ;;  %v509_v15 = vld [vmem:[%s4284_s1 + $0x88] sm:$0xff]  ;;  %v2280_v16 = vld [vmem:[%s4284_s1 + $0x130] sm:$0xff]  ;;  %v2281_v17 = vld [vmem:[%s4284_s1 + $0x138] sm:$0xff]  ;;  %vm2190_vm13 = vcmask 73728   ;;  %s2698_s20 = scalar_lea.hbm %s2697_s16, 1 }
  0x1f   : > { %1004 = vmatpush.msra.mxu2 %v510_v10  ;;  %1033 = vmatpush.msra.mxu3 %v511_v11  ;;  %v506_v18 = vld [vmem:[%s4284_s1 + $0x70] sm:$0xff]  ;;  %v507_v19 = vld [vmem:[%s4284_s1 + $0x78] sm:$0xff]  ;;  %v2278_v20 = vld [vmem:[%s4284_s1 + $0x120] sm:$0xff]  ;;  %p2699_p11 = scmp.ne.s32.totalorder %s2697_s16, %s2698_s20 }
  0x20   : > { %939 = vmatpush.msra.mxu0 %v2282_v12  ;;  %968 = vmatpush.msra.mxu1 %v2283_v13  ;;  %v2279_v21 = vld [vmem:[%s4284_s1 + $0x128] sm:$0xff]  ;;  %v504_v22 = vld [vmem:[%s4284_s1 + $0x60] sm:$0xff]  ;;  %v2276_v24 = vld [vmem:[%s4284_s1 + $0x110] sm:$0xff] }
  0x21   : > { %1005 = vmatpush.msra.mxu2 %v508_v14  ;;  %1034 = vmatpush.msra.mxu3 %v509_v15  ;;  %v505_v23 = vld [vmem:[%s4284_s1 + $0x68] sm:$0xff]  ;;  %v2277_v25 = vld [vmem:[%s4284_s1 + $0x118] sm:$0xff]  ;;  %v502_v26 = vld [vmem:[%s4284_s1 + $0x50] sm:$0xff]  ;;  %p2700_p12 = pnand %p2699_p11, %p2864_p5 }
  0x22   : > { %940 = vmatpush.msra.mxu0 %v2280_v16  ;;  %969 = vmatpush.msra.mxu1 %v2281_v17  ;;  %v503_v27 = vld [vmem:[%s4284_s1 + $0x58] sm:$0xff]  ;;  %v2274_v28 = vld [vmem:[%s4284_s1 + $0x100] sm:$0xff]  ;;  %v2275_v29 = vld [vmem:[%s4284_s1 + $0x108] sm:$0xff] }
  0x23   : > { %1006 = vmatpush.msra.mxu2 %v506_v18  ;;  %1035 = vmatpush.msra.mxu3 %v507_v19  ;;  %v500_v30 = vld [vmem:[%s4284_s1 + $0x40] sm:$0xff]  ;;  %v501_v31 = vld [vmem:[%s4284_s1 + $0x48] sm:$0xff]  ;;  %v2272_v32 = vld [vmem:[%s4284_s1 + $0xf0] sm:$0xff]  ;;  %p2701_p13 = pneg %p2700_p12 }
  0x24   : > { %941 = vmatpush.msra.mxu0 %v2278_v20  ;;  %970 = vmatpush.msra.mxu1 %v2279_v21  ;;  %v2273_v33 = vld [vmem:[%s4284_s1 + $0xf8] sm:$0xff]  ;;  %v498_v34 = vld [vmem:[%s4284_s1 + $0x30] sm:$0xff]  ;;  %v2270_v36 = vld [vmem:[%s4284_s1 + $0xe0] sm:$0xff] }
  0x25   : > { %1007 = vmatpush.msra.mxu2 %v504_v22  ;;  %1036 = vmatpush.msra.mxu3 %v505_v23  ;;  %v499_v35 = vld [vmem:[%s4284_s1 + $0x38] sm:$0xff]  ;;  %v2271_v37 = vld [vmem:[%s4284_s1 + $0xe8] sm:$0xff]  ;;  %v3001_v38 = vld [vmem:[%s2980_s21] sm:$0xff] }
  0x26   : > { %942 = vmatpush.msra.mxu0 %v2276_v24  ;;  %971 = vmatpush.msra.mxu1 %v2277_v25  ;;  %v3004_v39 = vld [vmem:[%s2980_s21 + $0x8] sm:$0xff]  ;;  %v496_v40 = vld [vmem:[%s4284_s1 + $0x20] sm:$0xff]  ;;  %v2268_v42 = vld [vmem:[%s4284_s1 + $0xd0] sm:$0xff]  ;;  %v916_v44 = vrot.slane %v3001_v38, 1 }
  0x27   : > { %1008 = vmatpush.msra.mxu2 %v502_v26  ;;  %1037 = vmatpush.msra.mxu3 %v503_v27  ;;  %v497_v41 = vld [vmem:[%s4284_s1 + $0x28] sm:$0xff]  ;;  %v2269_v43 = vld [vmem:[%s4284_s1 + $0xd8] sm:$0xff]  ;;  %v917_v45 = vrot.slane %v3004_v39, 1  ;;  %v494_v46 = vld [vmem:[%s4284_s1 + $0x10] sm:$0xff] }
  0x28   : > { %943 = vmatpush.msra.mxu0 %v2274_v28  ;;  %972 = vmatpush.msra.mxu1 %v2275_v29  ;;  %v495_v47 = vld [vmem:[%s4284_s1 + $0x18] sm:$0xff]  ;;  %v2266_v48 = vld [vmem:[%s4284_s1 + $0xc0] sm:$0xff]  ;;  %v2267_v49 = vld [vmem:[%s4284_s1 + $0xc8] sm:$0xff] }
  0x29   : > { %1009 = vmatpush.msra.mxu2 %v500_v30  ;;  %1038 = vmatpush.msra.mxu3 %v501_v31  ;;  %v492_v50 = vld [vmem:[%s4284_s1] sm:$0xff]  ;;  %v493_v51 = vld [vmem:[%s4284_s1 + $0x8] sm:$0xff]  ;;  %v918_v52 = vsel %vm915_vm0, %v916_v44, %v917_v45  ;;  %v3040_v53 = vld [vmem:[%s2980_s21 + $0x10] sm:$0xff]  ;;  %v1140_v44 = vrot.slane %v3004_v39, 3 }
  0x2a   : > { %944 = vmatpush.msra.mxu0 %v2272_v32  ;;  %973 = vmatpush.msra.mxu1 %v2273_v33  ;;  %v2312_v54 = vld [vmem:[%s4284_s1 + $0x230] sm:$0xff]  ;;  %v2313_v55 = vld [vmem:[%s4284_s1 + $0x238] sm:$0xff]  ;;  %v919_v58 = vrot.slane %v3040_v53, 1  ;;  %v2310_v59 = vld [vmem:[%s4284_s1 + $0x220] sm:$0xff] }
  0x2b   : > { %1010 = vmatpush.msra.mxu2 %v498_v34  ;;  %1039 = vmatpush.msra.mxu3 %v499_v35  ;;  %v2336_v56 = vld [vmem:[%s4284_s1 + $0x2f0] sm:$0xff]  ;;  %v2337_v57 = vld [vmem:[%s4284_s1 + $0x2f8] sm:$0xff]  ;;  %v2311_v60 = vld [vmem:[%s4284_s1 + $0x228] sm:$0xff] }
  0x2c   : > { %945 = vmatpush.msra.mxu0 %v2270_v36  ;;  %974 = vmatpush.msra.mxu1 %v2271_v37  ;;  %v2334_v61 = vld [vmem:[%s4284_s1 + $0x2e0] sm:$0xff]  ;;  %v2335_v62 = vld [vmem:[%s4284_s1 + $0x2e8] sm:$0xff]  ;;  %v2308_v63 = vld [vmem:[%s4284_s1 + $0x210] sm:$0xff]  ;;  %v920_v3 = vsel %vm915_vm0, %v917_v45, %v919_v58  ;;  %v1057_v37 = vrot.slane %v3001_v38, 2 }
  0x2d   : > { %1011 = vmatpush.msra.mxu2 %v496_v40  ;;  %1040 = vmatpush.msra.mxu3 %v497_v41  ;;  %v2309_v0 = vld [vmem:[%s4284_s1 + $0x218] sm:$0xff]  ;;  %v2332_v1 = vld [vmem:[%s4284_s1 + $0x2d0] sm:$0xff]  ;;  %v2306_v5 = vld [vmem:[%s4284_s1 + $0x200] sm:$0xff]  ;;  %v1058_v40 = vrot.slane %v3004_v39, 2 }
  0x2e   : > { %946 = vmatpush.msra.mxu0 %v2268_v42  ;;  %975 = vmatpush.msra.mxu1 %v2269_v43  ;;  %v2333_v2 = vld [vmem:[%s4284_s1 + $0x2d8] sm:$0xff]  ;;  %v2307_v6 = vld [vmem:[%s4284_s1 + $0x208] sm:$0xff]  ;;  %v2330_v7 = vld [vmem:[%s4284_s1 + $0x2c0] sm:$0xff]  ;;  %v1139_v43 = vrot.slane %v3001_v38, 3 }
  0x2f   : > { %1012 = vmatpush.msra.mxu2 %v494_v46  ;;  %1041 = vmatpush.msra.mxu3 %v495_v47  ;;  %v3087_v4 = vld [vmem:[%s2980_s21 + $0x18] sm:$0xff]  ;;  %v2331_v8 = vld [vmem:[%s4284_s1 + $0x2c8] sm:$0xff]  ;;  %v2304_v10 = vld [vmem:[%s4284_s1 + $0x1f0] sm:$0xff]  ;;  %s2702_s21 = scalar_lea.hbm %s4298_s15, 2 }
  0x30   : > { %947 = vmatpush.msra.mxu0 %v2266_v48  ;;  %976 = vmatpush.msra.mxu1 %v2267_v49  ;;  %v921_v9 = vrot.slane %v3087_v4, 1  ;;  %v2305_v11 = vld [vmem:[%s4284_s1 + $0x1f8] sm:$0xff]  ;;  %v2328_v12 = vld [vmem:[%s4284_s1 + $0x2b0] sm:$0xff]  ;;  %v2302_v14 = vld [vmem:[%s4284_s1 + $0x1e0] sm:$0xff]  ;;  %v1059_v49 = vsel %vm1056_vm2, %v1057_v37, %v1058_v40  ;;  %p2704_p1 = scmp.lt.s32.totalorder %s2702_s21, %s2698_s20 }
  0x31   : > { %1013 = vmatpush.msra.mxu2 %v492_v50  ;;  %1042 = vmatpush.msra.mxu3 %v493_v51  ;;  %v2329_v13 = vld [vmem:[%s4284_s1 + $0x2b8] sm:$0xff]  ;;  %v2303_v15 = vld [vmem:[%s4284_s1 + $0x1e8] sm:$0xff]  ;;  %v2326_v16 = vld [vmem:[%s4284_s1 + $0x2a0] sm:$0xff]  ;;  %v1141_v50 = vsel %vm1138_vm3, %v1139_v43, %v1140_v44  ;;  %v1221_v51 = vrot.slane %v3001_v38, 4 }
  0x32   : > { %2534 = vmatmul.msk.f32.vlgmr.msra.gmra.mxu0 %vm923_vm1, %v918_v52  ;;  %2538 = vmatmul.msk.f32.vlgmr.msra.gmra.mxu1 %vm923_vm1, %v918_v52  ;;  %v2327_v17 = vld [vmem:[%s4284_s1 + $0x2a8] sm:$0xff]  ;;  %v922_v18 = vsel %vm915_vm0, %v919_v58, %v921_v9  ;;  %v2300_v19 = vld [vmem:[%s4284_s1 + $0x1d0] sm:$0xff]  ;;  %v2301_v20 = vld [vmem:[%s4284_s1 + $0x1d8] sm:$0xff]  ;;  %v1222_v52 = vrot.slane %v3004_v39, 4  ;;  %p2705_p2 = por %p2704_p1, %p2703_p0 }
  0x33   : > { %2542 = vmatmul.msk.f32.vlgmr.msra.gmra.mxu2 %vm923_vm1, %v3001_v38  ;;  %2546 = vmatmul.msk.f32.vlgmr.msra.gmra.mxu3 %vm923_vm1, %v3001_v38  ;;  %v2324_v21 = vld [vmem:[%s4284_s1 + $0x290] sm:$0xff]  ;;  %v2325_v22 = vld [vmem:[%s4284_s1 + $0x298] sm:$0xff]  ;;  %v2298_v23 = vld [vmem:[%s4284_s1 + $0x1c0] sm:$0xff]  ;;  %v1224_v38 = vrot.slane %v3040_v53, 4 }
  0x34   : > { %1076 = vmatpush.msrb.mxu0 %v2312_v54  ;;  %1105 = vmatpush.msrb.mxu1 %v2313_v55  ;;  %v2299_v24 = vld [vmem:[%s4284_s1 + $0x1c8] sm:$0xff]  ;;  %v2322_v25 = vld [vmem:[%s4284_s1 + $0x280] sm:$0xff]  ;;  %v2296_v27 = vld [vmem:[%s4284_s1 + $0x1b0] sm:$0xff]  ;;  %p2706_p3 = pnand %p2705_p2, %p2701_p13 }
  0x35   : > { %1158 = vmatpush.msrb.mxu2 %v2336_v56  ;;  %1187 = vmatpush.msrb.mxu3 %v2337_v57  ;;  %v2323_v26 = vld [vmem:[%s4284_s1 + $0x288] sm:$0xff]  ;;  %v2297_v28 = vld [vmem:[%s4284_s1 + $0x1b8] sm:$0xff]  ;;  %v2320_v29 = vld [vmem:[%s4284_s1 + $0x270] sm:$0xff]  ;;  %v3234_v56 = vsel %vm1220_vm4, %v1221_v51, %v1222_v52 }
  0x36   : > { %1077 = vmatpush.msrb.mxu0 %v2310_v59  ;;  %1106 = vmatpush.msrb.mxu1 %v2311_v60  ;;  %v2321_v30 = vld [vmem:[%s4284_s1 + $0x278] sm:$0xff]  ;;  %v2294_v31 = vld [vmem:[%s4284_s1 + $0x1a0] sm:$0xff]  ;;  %v2295_v32 = vld [vmem:[%s4284_s1 + $0x1a8] sm:$0xff]  ;;  %v1142_v59 = vrot.slane %v3040_v53, 3  ;;  %v3248_v60 = vsel %vm1220_vm4, %v1222_v52, %v1224_v38 }
  0x37   : > { %1159 = vmatpush.msrb.mxu2 %v2334_v61  ;;  %1188 = vmatpush.msrb.mxu3 %v2335_v62  ;;  %v2318_v33 = vld [vmem:[%s4284_s1 + $0x260] sm:$0xff]  ;;  %v2319_v34 = vld [vmem:[%s4284_s1 + $0x268] sm:$0xff]  ;;  %v2292_v35 = vld [vmem:[%s4284_s1 + $0x190] sm:$0xff] }
  0x38   : > { %1078 = vmatpush.msrb.mxu0 %v2308_v63  ;;  %1107 = vmatpush.msrb.mxu1 %v2309_v0  ;;  %v2293_v36 = vld [vmem:[%s4284_s1 + $0x198] sm:$0xff]  ;;  %v2316_v41 = vld [vmem:[%s4284_s1 + $0x250] sm:$0xff]  ;;  %v2290_v45 = vld [vmem:[%s4284_s1 + $0x180] sm:$0xff]  ;;  %v1143_v0 = vsel %vm1138_vm3, %v1140_v44, %v1142_v59 }
  0x39   : > { %1160 = vmatpush.msrb.mxu2 %v2332_v1  ;;  %1189 = vmatpush.msrb.mxu3 %v2333_v2  ;;  %v2317_v42 = vld [vmem:[%s4284_s1 + $0x258] sm:$0xff]  ;;  %v2291_v46 = vld [vmem:[%s4284_s1 + $0x188] sm:$0xff]  ;;  %v2314_v47 = vld [vmem:[%s4284_s1 + $0x240] sm:$0xff]  ;;  %v1226_v2 = vrot.slane %v3087_v4, 4 }
  0x3a   : > { %2535 = vmatmul.msk.f32.gmra.mxu0 %vm923_vm1, %v920_v3  ;;  %2539 = vmatmul.msk.f32.gmra.mxu1 %vm923_vm1, %v920_v3  ;;  %v2315_v48 = vld [vmem:[%s4284_s1 + $0x248] sm:$0xff]  ;;  %v2360_v54 = vld [vmem:[%s4284_s1 + $0x3b0] sm:$0xff]  ;;  %v2361_v55 = vld [vmem:[%s4284_s1 + $0x3b8] sm:$0xff]  ;;  %v1062_v3 = vrot.slane %v3087_v4, 2 }
  0x3b   : > { %2543 = vmatmul.msk.f32.gmra.mxu2 %vm923_vm1, %v3004_v39  ;;  %2547 = vmatmul.msk.f32.gmra.mxu3 %vm923_vm1, %v3004_v39  ;;  %v1060_v39 = vrot.slane %v3040_v53, 2  ;;  %v2358_v57 = vld [vmem:[%s4284_s1 + $0x3a0] sm:$0xff]  ;;  %v2359_v58 = vld [vmem:[%s4284_s1 + $0x3a8] sm:$0xff]  ;;  %v2356_v61 = vld [vmem:[%s4284_s1 + $0x390] sm:$0xff] }
  0x3c   : > { %1079 = vmatpush.msrb.mxu0 %v2306_v5  ;;  %1108 = vmatpush.msrb.mxu1 %v2307_v6  ;;  %v2357_v62 = vld [vmem:[%s4284_s1 + $0x398] sm:$0xff]  ;;  %v2355_v1 = vld [vmem:[%s4284_s1 + $0x388] sm:$0xff]  ;;  %v2352_v5 = vld [vmem:[%s4284_s1 + $0x370] sm:$0xff] }
  0x3d   : > { %1161 = vmatpush.msrb.mxu2 %v2330_v7  ;;  %1190 = vmatpush.msrb.mxu3 %v2331_v8  ;;  %v1061_v63 = vsel %vm1056_vm2, %v1058_v40, %v1060_v39  ;;  %v2353_v6 = vld [vmem:[%s4284_s1 + $0x378] sm:$0xff]  ;;  %v1144_v7 = vrot.slane %v3087_v4, 3  ;;  %v1227_v8 = vsel %vm1220_vm4, %v1224_v38, %v1226_v2 }
  0x3e   : > { %1080 = vmatpush.msrb.mxu0 %v2304_v10  ;;  %1109 = vmatpush.msrb.mxu1 %v2305_v11  ;;  %v2351_v10 = vld [vmem:[%s4284_s1 + $0x368] sm:$0xff]  ;;  %v1063_v11 = vsel %vm1056_vm2, %v1060_v39, %v1062_v3 }
  0x3f   : > { %1162 = vmatpush.msrb.mxu2 %v2328_v12  ;;  %1191 = vmatpush.msrb.mxu3 %v2329_v13  ;;  %v1145_v12 = vsel %vm1138_vm3, %v1142_v59, %v1144_v7  ;;  %v2349_v13 = vld [vmem:[%s4284_s1 + $0x358] sm:$0xff] }
  0x40   : > { %1081 = vmatpush.msrb.mxu0 %v2302_v14  ;;  %1110 = vmatpush.msrb.mxu1 %v2303_v15  ;;  %v2346_v14 = vld [vmem:[%s4284_s1 + $0x340] sm:$0xff]  ;;  %v2347_v15 = vld [vmem:[%s4284_s1 + $0x348] sm:$0xff] }
  0x41   : > { %1163 = vmatpush.msrb.mxu2 %v2326_v16  ;;  %1192 = vmatpush.msrb.mxu3 %v2327_v17  ;;  %v2344_v16 = vld [vmem:[%s4284_s1 + $0x330] sm:$0xff]  ;;  %v2345_v17 = vld [vmem:[%s4284_s1 + $0x338] sm:$0xff] }
  0x42   : > { %2536 = vmatmul.msk.f32.gmra.mxu0 %vm923_vm1, %v922_v18  ;;  %2540 = vmatmul.msk.f32.gmra.mxu1 %vm923_vm1, %v922_v18  ;;  %v2342_v18 = vld [vmem:[%s4284_s1 + $0x320] sm:$0xff] }
  0x43   : > { %2544 = vmatmul.msk.f32.gmra.mxu2 %vm923_vm1, %v3040_v53  ;;  %2548 = vmatmul.msk.f32.gmra.mxu3 %vm923_vm1, %v3040_v53  ;;  %v2354_v53 = vld [vmem:[%s4284_s1 + $0x380] sm:$0xff] }
  0x44   : > { %1082 = vmatpush.msrb.mxu0 %v2300_v19  ;;  %1111 = vmatpush.msrb.mxu1 %v2301_v20  ;;  %v2343_v19 = vld [vmem:[%s4284_s1 + $0x328] sm:$0xff]  ;;  %v2340_v20 = vld [vmem:[%s4284_s1 + $0x310] sm:$0xff] }
  0x45   : > { %1164 = vmatpush.msrb.mxu2 %v2324_v21  ;;  %1193 = vmatpush.msrb.mxu3 %v2325_v22  ;;  %v2341_v21 = vld [vmem:[%s4284_s1 + $0x318] sm:$0xff]  ;;  %v2338_v22 = vld [vmem:[%s4284_s1 + $0x300] sm:$0xff] }
  0x46   : > { %1083 = vmatpush.msrb.mxu0 %v2298_v23  ;;  %1112 = vmatpush.msrb.mxu1 %v2299_v24  ;;  %v2339_v23 = vld [vmem:[%s4284_s1 + $0x308] sm:$0xff] }
  0x47   : > { %1165 = vmatpush.msrb.mxu2 %v2322_v25  ;;  %1194 = vmatpush.msrb.mxu3 %v2323_v26 }
  0x48   : > { %1084 = vmatpush.msrb.mxu0 %v2296_v27  ;;  %1113 = vmatpush.msrb.mxu1 %v2297_v28 }
  0x49   : > { %1166 = vmatpush.msrb.mxu2 %v2320_v29  ;;  %1195 = vmatpush.msrb.mxu3 %v2321_v30 }
  0x4a   : > { %2537 = vmatmul.msk.f32.gmra.mxu0 %vm923_vm1, %v921_v9  ;;  %2541 = vmatmul.msk.f32.gmra.mxu1 %vm923_vm1, %v921_v9  ;;  %v2350_v9 = vld [vmem:[%s4284_s1 + $0x360] sm:$0xff] }
  0x4b   : > { %2545 = vmatmul.msk.f32.gmra.mxu2 %vm923_vm1, %v3087_v4  ;;  %2549 = vmatmul.msk.f32.gmra.mxu3 %vm923_vm1, %v3087_v4  ;;  %v2348_v4 = vld [vmem:[%s4284_s1 + $0x350] sm:$0xff] }
  0x4c   : > { %1085 = vmatpush.msrb.mxu0 %v2294_v31  ;;  %1114 = vmatpush.msrb.mxu1 %v2295_v32 }
  0x4d   : > { %1167 = vmatpush.msrb.mxu2 %v2318_v33  ;;  %1196 = vmatpush.msrb.mxu3 %v2319_v34 }
  0x4e   : > { %1086 = vmatpush.msrb.mxu0 %v2292_v35  ;;  %1115 = vmatpush.msrb.mxu1 %v2293_v36 }
  0x4f   : > { %1168 = vmatpush.msrb.mxu2 %v2316_v41  ;;  %1197 = vmatpush.msrb.mxu3 %v2317_v42 }
  0x50   : > { %1087 = vmatpush.msrb.mxu0 %v2290_v45  ;;  %1116 = vmatpush.msrb.mxu1 %v2291_v46 }
  0x51   : > { %1169 = vmatpush.msrb.mxu2 %v2314_v47  ;;  %1198 = vmatpush.msrb.mxu3 %v2315_v48 }
  0x52   : > { %2550 = vmatmul.msk.f32.vlgmr.msrb.gmra.mxu0 %vm923_vm1, %v1059_v49  ;;  %2554 = vmatmul.msk.f32.vlgmr.msrb.gmra.mxu1 %vm923_vm1, %v1059_v49 }
  0x53   : > { %2558 = vmatmul.msk.f32.vlgmr.msrb.gmra.mxu2 %vm923_vm1, %v1141_v50  ;;  %2562 = vmatmul.msk.f32.vlgmr.msrb.gmra.mxu3 %vm923_vm1, %v1141_v50 }
  0x54   : > { %1240 = vmatpush.msra.mxu0 %v2360_v54  ;;  %1269 = vmatpush.msra.mxu1 %v2361_v55 }
  0x56   : > { %1241 = vmatpush.msra.mxu0 %v2358_v57  ;;  %1270 = vmatpush.msra.mxu1 %v2359_v58 }
  0x58   : > { %1242 = vmatpush.msra.mxu0 %v2356_v61  ;;  %1271 = vmatpush.msra.mxu1 %v2357_v62 }
  0x5a   : > { %2551 = vmatmul.msk.f32.gmra.mxu0 %vm923_vm1, %v1061_v63  ;;  %2555 = vmatmul.msk.f32.gmra.mxu1 %vm923_vm1, %v1061_v63 }
  0x5b   : > { %2559 = vmatmul.msk.f32.gmra.mxu2 %vm923_vm1, %v1143_v0  ;;  %2563 = vmatmul.msk.f32.gmra.mxu3 %vm923_vm1, %v1143_v0 }
  0x5c   : > { %1243 = vmatpush.msra.mxu0 %v2354_v53  ;;  %1272 = vmatpush.msra.mxu1 %v2355_v1 }
  0x5e   : > { %1244 = vmatpush.msra.mxu0 %v2352_v5  ;;  %1273 = vmatpush.msra.mxu1 %v2353_v6 }
  0x60   : > { %1245 = vmatpush.msra.mxu0 %v2350_v9  ;;  %1274 = vmatpush.msra.mxu1 %v2351_v10 }
  0x62   : > { %2552 = vmatmul.msk.f32.gmra.mxu0 %vm923_vm1, %v1063_v11  ;;  %2556 = vmatmul.msk.f32.gmra.mxu1 %vm923_vm1, %v1063_v11 }
  0x63   : > { %2560 = vmatmul.msk.f32.gmra.mxu2 %vm923_vm1, %v1145_v12  ;;  %2564 = vmatmul.msk.f32.gmra.mxu3 %vm923_vm1, %v1145_v12 }
  0x64   : > { %1246 = vmatpush.msra.mxu0 %v2348_v4  ;;  %1275 = vmatpush.msra.mxu1 %v2349_v13 }
  0x66   : > { %1247 = vmatpush.msra.mxu0 %v2346_v14  ;;  %1276 = vmatpush.msra.mxu1 %v2347_v15 }
  0x68   : > { %1248 = vmatpush.msra.mxu0 %v2344_v16  ;;  %1277 = vmatpush.msra.mxu1 %v2345_v17 }
  0x6a   : > { %2553 = vmatmul.msk.f32.gmra.mxu0 %vm923_vm1, %v1062_v3  ;;  %2557 = vmatmul.msk.f32.gmra.mxu1 %vm923_vm1, %v1062_v3 }
  0x6b   : > { %2561 = vmatmul.msk.f32.gmra.mxu2 %vm923_vm1, %v1144_v7  ;;  %2565 = vmatmul.msk.f32.gmra.mxu3 %vm923_vm1, %v1144_v7 }
  0x6c   : > { %1249 = vmatpush.msra.mxu0 %v2342_v18  ;;  %1278 = vmatpush.msra.mxu1 %v2343_v19 }
  0x6e   : > { %1250 = vmatpush.msra.mxu0 %v2340_v20  ;;  %1279 = vmatpush.msra.mxu1 %v2341_v21 }
  0x70   : > { %1251 = vmatpush.msra.mxu0 %v2338_v22  ;;  %1280 = vmatpush.msra.mxu1 %v2339_v23  ;;  %v750_v23 = vld [vmem:[%s4287_s4 + $0x78] sm:$0xff] }
  0x72   : > { %2566 = vmatmul.msk.f32.vlgmr.msra.gmra.mxu0 %vm923_vm1, %v3234_v56  ;;  %2570 = vmatmul.msk.f32.vlgmr.msra.gmra.mxu1 %vm923_vm1, %v3234_v56 }
  0x73   : > { %1424 = vmatpush.msrb.mxu1 %v750_v23 }
  0x7a   : > { %2567 = vmatmul.msk.f32.gmra.mxu0 %vm923_vm1, %v3248_v60  ;;  %2571 = vmatmul.msk.f32.gmra.mxu1 %vm923_vm1, %v3248_v60 }
  0x82   : > { %2568 = vmatmul.msk.f32.gmra.mxu0 %vm923_vm1, %v1227_v8  ;;  %2572 = vmatmul.msk.f32.gmra.mxu1 %vm923_vm1, %v1227_v8 }
  0x8a   : > { %2569 = vmatmul.msk.f32.gmra.mxu0 %vm923_vm1, %v1226_v2  ;;  %2573 = vmatmul.msk.f32.gmra.mxu1 %vm923_vm1, %v1226_v2 }
  0xaf   : > { %v949_v24 = vpop.f32.mrf.mxu0  ;;  %v978_v25 = vpop.f32.mrf.mxu1 }
  0xb6   : > { %v1015_v28 = vpop.f32.mrf.mxu2  ;;  %v1044_v29 = vpop.f32.mrf.mxu3 }
  0xb7   : > { %v952_v26 = vpop.f32.mrf.mxu0  ;;  %v981_v27 = vpop.f32.mrf.mxu1  ;;  %v1016_v11 = vadd.f32 %v1015_v28, %v949_v24  ;;  %v1045_v12 = vadd.f32 %v1044_v29, %v978_v25  ;;  %v749_v24 = vld [vmem:[%s4287_s4 + $0x70] sm:$0xff] }
  0xb8   : > { %1425 = vmatpush.msrb.mxu1 %v749_v24 }
  0xbe   : > { %v1018_v32 = vpop.f32.mrf.mxu2  ;;  %v1047_v33 = vpop.f32.mrf.mxu3 }
  0xbf   : > { %v955_v30 = vpop.f32.mrf.mxu0  ;;  %v984_v31 = vpop.f32.mrf.mxu1  ;;  %v1019_v5 = vadd.f32 %v1018_v32, %v952_v26  ;;  %v1048_v6 = vadd.f32 %v1047_v33, %v981_v27  ;;  %v748_v32 = vld [vmem:[%s4287_s4 + $0x68] sm:$0xff] }
  0xc0   : > { %1426 = vmatpush.msrb.mxu1 %v748_v32  ;;  %v2382_v32 = vld [vmem:[%s4288_s5 + $0x150] sm:$0xf] }
  0xc1   : > { %2590 = vmatpush.msk.msrb.mxu0 %vm1220_vm4, %v2382_v32  ;;  %v2413_v32 = vld [vmem:[%s4288_s5 + $0x248] sm:$0xff] }
  0xc6   : > { %v1021_v40 = vpop.f32.mrf.mxu2  ;;  %v1050_v41 = vpop.f32.mrf.mxu3 }
  0xc7   : > { %v958_v34 = vpop.f32.mrf.mxu0  ;;  %v987_v35 = vpop.f32.mrf.mxu1  ;;  %v1022_v53 = vadd.f32 %v1021_v40, %v955_v30  ;;  %v1051_v1 = vadd.f32 %v1050_v41, %v984_v31  ;;  %v745_v40 = vld [vmem:[%s4287_s4 + $0x50] sm:$0xff]  ;;  %v731_v41 = vld [vmem:[%s4286_s3 + $0x8] sm:$0x3f] }
  0xce   : > { %v1024_v44 = vpop.f32.mrf.mxu2  ;;  %v1053_v45 = vpop.f32.mrf.mxu3 }
  0xcf   : > { %v1089_v36 = vpop.f32.mrf.mxu0  ;;  %v1118_v37 = vpop.f32.mrf.mxu1  ;;  %v1025_v61 = vadd.f32 %v1024_v44, %v958_v34  ;;  %v1054_v62 = vadd.f32 %v1053_v45, %v987_v35  ;;  %v730_v35 = vld [vmem:[%s4286_s3] sm:$0xff]  ;;  %v2465_v44 = vld [vmem:[%s4287_s4 + $0x110] sm:$0xff]  ;;  %v2464_v45 = vld [vmem:[%s4287_s4 + $0x108] sm:$0xff] }
  0xd0   : > { %v1130_v20 = vadd.f32 %v1089_v36, %v1016_v11  ;;  %v1131_v21 = vadd.f32 %v1118_v37, %v1045_v12  ;;  %v747_v36 = vld [vmem:[%s4287_s4 + $0x60] sm:$0xff]  ;;  %v746_v37 = vld [vmem:[%s4287_s4 + $0x58] sm:$0xff]  ;;  %v753_v12 = vld [vmem:[%s4287_s4 + $0x90] sm:$0xff] }
  0xd1   : > { %1427 = vmatpush.msrb.mxu1 %v747_v36  ;;  %v754_v11 = vld [vmem:[%s4287_s4 + $0x98] sm:$0xff]  ;;  %v2380_v36 = vld [vmem:[%s4288_s5 + $0x140] sm:$0xff] }
  0xd2   : > { %1547 = vmatpush.msrb.mxu0 %v2380_v36  ;;  %v2411_v36 = vld [vmem:[%s4288_s5 + $0x238] sm:$0xff] }
  0xd3   : > { %1428 = vmatpush.msrb.mxu1 %v746_v37  ;;  %v2381_v37 = vld [vmem:[%s4288_s5 + $0x148] sm:$0xff] }
  0xd5   : > { %1429 = vmatpush.msrb.mxu1 %v745_v40  ;;  %v628_v40 = vld [vmem:[%s4288_s5 + $0x60] sm:$0xff] }
  0xd6   : > { %v1171_v48 = vpop.f32.mrf.mxu2  ;;  %v1200_v49 = vpop.f32.mrf.mxu3 }
  0xd7   : > { %v1092_v42 = vpop.f32.mrf.mxu0  ;;  %v1121_v43 = vpop.f32.mrf.mxu1  ;;  %v1212_v25 = vadd.f32 %v1171_v48, %v1130_v20  ;;  %v1213_v28 = vadd.f32 %v1200_v49, %v1131_v21  ;;  %v2462_v48 = vld [vmem:[%s4287_s4 + $0xf8] sm:$0xff] }
  0xd8   : > { %v1132_v4 = vadd.f32 %v1092_v42, %v1019_v5  ;;  %v1133_v13 = vadd.f32 %v1121_v43, %v1048_v6  ;;  %v2467_v42 = vld [vmem:[%s4287_s4 + $0x120] sm:$0xff]  ;;  %v2466_v43 = vld [vmem:[%s4287_s4 + $0x118] sm:$0xff]  ;;  %v2453_v5 = vld [vmem:[%s4287_s4 + $0xb0] sm:$0xff] }
  0xd9   : > { %v2451_v49 = vld [vmem:[%s4286_s3 + $0x18] sm:$0x3f]  ;;  %v2469_v6 = vld [vmem:[%s4287_s4 + $0x130] sm:$0xff] }
  0xde   : > { %v1174_v52 = vpop.f32.mrf.mxu2  ;;  %v1203_v54 = vpop.f32.mrf.mxu3 }
  0xdf   : > { %v1095_v46 = vpop.f32.mrf.mxu0  ;;  %v1124_v47 = vpop.f32.mrf.mxu1  ;;  %v1214_v22 = vadd.f32 %v1174_v52, %v1132_v4  ;;  %v1215_v26 = vadd.f32 %v1203_v54, %v1133_v13  ;;  %v743_v52 = vld [vmem:[%s4287_s4 + $0x40] sm:$0xff]  ;;  %v2460_v54 = vld [vmem:[%s4287_s4 + $0xe8] sm:$0xff] }
  0xe0   : > { %v1134_v7 = vadd.f32 %v1095_v46, %v1022_v53  ;;  %v1135_v8 = vadd.f32 %v1124_v47, %v1051_v1  ;;  %v2450_v46 = vld [vmem:[%s4286_s3 + $0x10] sm:$0xff]  ;;  %v2463_v47 = vld [vmem:[%s4287_s4 + $0x100] sm:$0xff]  ;;  %v2470_v53 = vld [vmem:[%s4287_s4 + $0x138] sm:$0xff] }
  0xe1   : > { %v737_v1 = vld [vmem:[%s4287_s4 + $0x10] sm:$0xff]  ;;  %v752_v4 = vld [vmem:[%s4287_s4 + $0x88] sm:$0xff] }
  0xe6   : > { %v1177_v57 = vpop.f32.mrf.mxu2  ;;  %v1206_v58 = vpop.f32.mrf.mxu3 }
  0xe7   : > { %v1098_v50 = vpop.f32.mrf.mxu0  ;;  %v1127_v51 = vpop.f32.mrf.mxu1  ;;  %v1216_v16 = vadd.f32 %v1177_v57, %v1134_v7  ;;  %v1217_v17 = vadd.f32 %v1206_v58, %v1135_v8  ;;  %v740_v57 = vld [vmem:[%s4287_s4 + $0x28] sm:$0xff]  ;;  %v2457_v58 = vld [vmem:[%s4287_s4 + $0xd0] sm:$0xff]  ;;  %v735_v7 = vld [vmem:[%s4287_s4] sm:$0xff] }
  0xe8   : > { %v1136_v2 = vadd.f32 %v1098_v50, %v1025_v61  ;;  %v1137_v3 = vadd.f32 %v1127_v51, %v1054_v62  ;;  %v744_v50 = vld [vmem:[%s4287_s4 + $0x48] sm:$0xff]  ;;  %v2461_v51 = vld [vmem:[%s4287_s4 + $0xf0] sm:$0xff]  ;;  %v738_v62 = vld [vmem:[%s4287_s4 + $0x18] sm:$0xff] }
  0xe9   : > { %1430 = vmatpush.msrb.mxu1 %v744_v50  ;;  %v2472_v61 = vld [vmem:[%s4287_s4 + $0x148] sm:$0xff]  ;;  %v2374_v50 = vld [vmem:[%s4288_s5 + $0x110] sm:$0xff] }
  0xea   : > { %v2452_v8 = vld [vmem:[%s4287_s4 + $0xa8] sm:$0xff] }
  0xeb   : > { %1431 = vmatpush.msrb.mxu1 %v743_v52  ;;  %v622_v52 = vld [vmem:[%s4288_s5 + $0x30] sm:$0xff] }
  0xee   : > { %v1180_v63 = vpop.f32.mrf.mxu2  ;;  %v1209_v0 = vpop.f32.mrf.mxu3 }
  0xef   : > { %v1253_v55 = vpop.f32.mrf.mxu0  ;;  %v1282_v56 = vpop.f32.mrf.mxu1  ;;  %v1218_v9 = vadd.f32 %v1180_v63, %v1136_v2  ;;  %v1219_v10 = vadd.f32 %v1209_v0, %v1137_v3  ;;  %v2455_v63 = vld [vmem:[%s4287_s4 + $0xc0] sm:$0xff]  ;;  %v2454_v2 = vld [vmem:[%s4287_s4 + $0xb8] sm:$0xff]  ;;  %v736_v3 = vld [vmem:[%s4287_s4 + $0x8] sm:$0xff] }
  0xf0   : > { %v1294_v33 = vadd.f32 %v1253_v55, %v1212_v25  ;;  %v1295_v34 = vadd.f32 %v1282_v56, %v1213_v28  ;;  %v742_v55 = vld [vmem:[%s4287_s4 + $0x38] sm:$0xff]  ;;  %v2459_v56 = vld [vmem:[%s4287_s4 + $0xe0] sm:$0xff]  ;;  %v634_v25 = vld [vmem:[%s4288_s5 + $0x90] sm:$0xff] }
  0xf1   : > { %1432 = vmatpush.msrb.mxu1 %v742_v55  ;;  %v2471_v0 = vld [vmem:[%s4287_s4 + $0x140] sm:$0xff]  ;;  %v635_v28 = vld [vmem:[%s4288_s5 + $0x98] sm:$0xff] }
  0xf2   : > { %v2372_v55 = vld [vmem:[%s4288_s5 + $0x100] sm:$0xff] }
  0xf7   : > { %v1256_v38 = vpop.f32.mrf.mxu0  ;;  %v1285_v39 = vpop.f32.mrf.mxu1 }
  0xf8   : > { %v1296_v29 = vadd.f32 %v1256_v38, %v1214_v22  ;;  %v1297_v31 = vadd.f32 %v1285_v39, %v1215_v26  ;;  %v741_v38 = vld [vmem:[%s4287_s4 + $0x30] sm:$0xff]  ;;  %v2458_v39 = vld [vmem:[%s4287_s4 + $0xd8] sm:$0xff] }
  0xf9   : > { %1433 = vmatpush.msrb.mxu1 %v741_v38  ;;  %v620_v38 = vld [vmem:[%s4288_s5 + $0x20] sm:$0xff] }
  0xfb   : > { %1434 = vmatpush.msrb.mxu1 %v740_v57  ;;  %v2370_v57 = vld [vmem:[%s4288_s5 + $0xf0] sm:$0xff] }
  0xff   : > { %v1259_v59 = vpop.f32.mrf.mxu0  ;;  %v1288_v60 = vpop.f32.mrf.mxu1 }
 0x100   : > { %v1298_v27 = vadd.f32 %v1259_v59, %v1216_v16  ;;  %v1299_v30 = vadd.f32 %v1288_v60, %v1217_v17  ;;  %v739_v59 = vld [vmem:[%s4287_s4 + $0x20] sm:$0xff]  ;;  %v2456_v60 = vld [vmem:[%s4287_s4 + $0xc8] sm:$0xff] }
 0x101   : > { %1435 = vmatpush.msrb.mxu1 %v739_v59  ;;  %v618_v59 = vld [vmem:[%s4288_s5 + $0x10] sm:$0xff] }
 0x103   : > { %1436 = vmatpush.msrb.mxu1 %v738_v62  ;;  %v2369_v62 = vld [vmem:[%s4288_s5 + $0xe8] sm:$0xff] }
 0x105   : > { %1437 = vmatpush.msrb.mxu1 %v737_v1  ;;  %v2427_v1 = vld [vmem:[%s4288_s5 + $0x2b8] sm:$0xf] }
 0x107   : > { %v1262_v14 = vpop.f32.mrf.mxu0  ;;  %v1291_v15 = vpop.f32.mrf.mxu1  ;;  %1438 = vmatpush.msrb.mxu1 %v736_v3  ;;  %v2367_v3 = vld [vmem:[%s4288_s5 + $0xd8] sm:$0xff] }
 0x108   : > { %v1300_v18 = vadd.f32 %v1262_v14, %v1218_v9  ;;  %v1301_v19 = vadd.f32 %v1291_v15, %v1219_v10  ;;  %v2468_v9 = vld [vmem:[%s4287_s4 + $0x128] sm:$0xff]  ;;  %v755_v10 = vld [vmem:[%s4287_s4 + $0xa0] sm:$0xff] }
 0x109   : > { %1439 = vmatpush.msrb.mxu1 %v735_v7  ;;  %v751_v15 = vld [vmem:[%s4287_s4 + $0x80] sm:$0xff] }
 0x10a   : > { %2574 = vmatpush.msk.msra.mxu2 %vm1220_vm4, %v1300_v18  ;;  %2577 = vmatpush.msk.msra.mxu3 %vm1220_vm4, %v1301_v19  ;;  %v2364_v7 = vld [vmem:[%s4288_s5 + $0xc0] sm:$0xff] }
 0x10b   : > { %1458 = vmatpush.msra.mxu1 %v755_v10  ;;  %v2423_v10 = vld [vmem:[%s4288_s5 + $0x298] sm:$0xff] }
 0x10c   : > { %1328 = vmatpush.msra.mxu2 %v1298_v27  ;;  %1351 = vmatpush.msra.mxu3 %v1299_v30 }
 0x10d   : > { %1459 = vmatpush.msra.mxu1 %v754_v11  ;;  %v2362_v11 = vld [vmem:[%s4288_s5 + $0xb0] sm:$0xff] }
 0x10e   : > { %1329 = vmatpush.msra.mxu2 %v1296_v29  ;;  %1352 = vmatpush.msra.mxu3 %v1297_v31 }
 0x10f   : > { %1460 = vmatpush.msra.mxu1 %v753_v12  ;;  %v2363_v12 = vld [vmem:[%s4288_s5 + $0xb8] sm:$0xff] }
 0x110   : > { %1330 = vmatpush.msra.mxu2 %v1294_v33  ;;  %1353 = vmatpush.msra.mxu3 %v1295_v34 }
 0x111   : > { %2575 = vmatmul.msk.f32.vlgmr.msra.gmra.mxu2 %vm1302_vm5, %v730_v35  ;;  %2578 = vmatmul.msk.f32.vlgmr.msra.gmra.mxu3 %vm1302_vm5, %v730_v35  ;;  %v631_v35 = vld [vmem:[%s4288_s5 + $0x78] sm:$0xff] }
 0x112   : > { %2580 = vmatpush.msk.msrb.mxu2 %vm1220_vm4, %v1300_v18  ;;  %2583 = vmatpush.msk.msrb.mxu3 %vm1220_vm4, %v1301_v19  ;;  %v636_v18 = vld [vmem:[%s4288_s5 + $0xa0] sm:$0xf]  ;;  %v637_v19 = vld [vmem:[%s4288_s5 + $0xa8] sm:$0xf] }
 0x113   : > { %1461 = vmatpush.msra.mxu1 %v752_v4  ;;  %v2404_v4 = vld [vmem:[%s4288_s5 + $0x200] sm:$0xf] }
 0x114   : > { %1380 = vmatpush.msrb.mxu2 %v1298_v27  ;;  %1403 = vmatpush.msrb.mxu3 %v1299_v30 }
 0x115   : > { %1462 = vmatpush.msra.mxu1 %v751_v15  ;;  %v2421_v15 = vld [vmem:[%s4288_s5 + $0x288] sm:$0xff] }
 0x116   : > { %1381 = vmatpush.msrb.mxu2 %v1296_v29  ;;  %1404 = vmatpush.msrb.mxu3 %v1297_v31  ;;  %v632_v29 = vld [vmem:[%s4288_s5 + $0x80] sm:$0xff]  ;;  %v633_v31 = vld [vmem:[%s4288_s5 + $0x88] sm:$0xff] }
 0x118   : > { %1382 = vmatpush.msrb.mxu2 %v1294_v33  ;;  %1405 = vmatpush.msrb.mxu3 %v1295_v34  ;;  %v2383_v33 = vld [vmem:[%s4288_s5 + $0x158] sm:$0xf]  ;;  %v630_v34 = vld [vmem:[%s4288_s5 + $0x70] sm:$0xff] }
 0x119   : > { %2576 = vmatmul.msk.f32.gmra.mxu2 %vm1302_vm5, %v731_v41  ;;  %2579 = vmatmul.msk.f32.gmra.mxu3 %vm1302_vm5, %v731_v41  ;;  %v629_v41 = vld [vmem:[%s4288_s5 + $0x68] sm:$0xff] }
 0x11a   : > { %1470 = vmatpush.msra.mxu2 %v2467_v42  ;;  %1504 = vmatpush.msra.mxu3 %v2472_v61  ;;  %v2378_v42 = vld [vmem:[%s4288_s5 + $0x130] sm:$0xff]  ;;  %v2368_v61 = vld [vmem:[%s4288_s5 + $0xe0] sm:$0xff] }
 0x11b   : > { %1548 = vmatpush.msrb.mxu0 %v2378_v42  ;;  %v2409_v42 = vld [vmem:[%s4288_s5 + $0x228] sm:$0xff] }
 0x11c   : > { %1471 = vmatpush.msra.mxu2 %v2466_v43  ;;  %1505 = vmatpush.msra.mxu3 %v2471_v0  ;;  %v2379_v43 = vld [vmem:[%s4288_s5 + $0x138] sm:$0xff]  ;;  %v617_v0 = vld [vmem:[%s4288_s5 + $0x8] sm:$0xff] }
 0x11e   : > { %1472 = vmatpush.msra.mxu2 %v2465_v44  ;;  %1506 = vmatpush.msra.mxu3 %v2470_v53  ;;  %v626_v44 = vld [vmem:[%s4288_s5 + $0x50] sm:$0xff] }
 0x11f   : > { %v2426_v53 = vld [vmem:[%s4288_s5 + $0x2b0] sm:$0xf] }
 0x120   : > { %1473 = vmatpush.msra.mxu2 %v2464_v45  ;;  %1507 = vmatpush.msra.mxu3 %v2469_v6  ;;  %v627_v45 = vld [vmem:[%s4288_s5 + $0x58] sm:$0xff]  ;;  %v2425_v6 = vld [vmem:[%s4288_s5 + $0x2a8] sm:$0xff] }
 0x121   : > { %2581 = vmatmul.msk.f32.vlgmr.msrb.gmra.mxu2 %vm1302_vm5, %v2450_v46  ;;  %2584 = vmatmul.msk.f32.vlgmr.msrb.gmra.mxu3 %vm1302_vm5, %v2450_v46  ;;  %v2376_v46 = vld [vmem:[%s4288_s5 + $0x120] sm:$0xff] }
 0x122   : > { %1474 = vmatpush.msra.mxu2 %v2463_v47  ;;  %1508 = vmatpush.msra.mxu3 %v2468_v9  ;;  %v2377_v47 = vld [vmem:[%s4288_s5 + $0x128] sm:$0xff]  ;;  %v2422_v9 = vld [vmem:[%s4288_s5 + $0x290] sm:$0xff] }
 0x123   : > { %1549 = vmatpush.msrb.mxu0 %v2376_v46  ;;  %v2406_v46 = vld [vmem:[%s4288_s5 + $0x210] sm:$0xff] }
 0x124   : > { %1475 = vmatpush.msra.mxu2 %v2462_v48  ;;  %2596 = vmatpush.msk.msrb.mxu3 %vm1220_vm4, %v636_v18  ;;  %v624_v48 = vld [vmem:[%s4288_s5 + $0x40] sm:$0xff]  ;;  %v2418_v18 = vld [vmem:[%s4288_s5 + $0x270] sm:$0xff] }
 0x125   : > { %1550 = vmatpush.msrb.mxu0 %v2374_v50 }
 0x126   : > { %1476 = vmatpush.msra.mxu2 %v2461_v51  ;;  %1603 = vmatpush.msrb.mxu3 %v634_v25  ;;  %v2375_v51 = vld [vmem:[%s4288_s5 + $0x118] sm:$0xff] }
 0x127   : > { %1551 = vmatpush.msrb.mxu0 %v2372_v55  ;;  %v2415_v25 = vld [vmem:[%s4288_s5 + $0x258] sm:$0xff]  ;;  %v2384_v55 = vld [vmem:[%s4288_s5 + $0x160] sm:$0xff] }
 0x128   : > { %1477 = vmatpush.msra.mxu2 %v2460_v54  ;;  %1604 = vmatpush.msrb.mxu3 %v632_v29  ;;  %v623_v54 = vld [vmem:[%s4288_s5 + $0x38] sm:$0xff]  ;;  %v2397_v29 = vld [vmem:[%s4288_s5 + $0x1c8] sm:$0xff] }
 0x129   : > { %2582 = vmatmul.msk.f32.gmra.mxu2 %vm1302_vm5, %v2451_v49  ;;  %2585 = vmatmul.msk.f32.gmra.mxu3 %vm1302_vm5, %v2451_v49  ;;  %v625_v49 = vld [vmem:[%s4288_s5 + $0x48] sm:$0xff] }
 0x12a   : > { %1478 = vmatpush.msra.mxu2 %v2459_v56  ;;  %1605 = vmatpush.msrb.mxu3 %v630_v34  ;;  %v2373_v56 = vld [vmem:[%s4288_s5 + $0x108] sm:$0xff]  ;;  %v2395_v34 = vld [vmem:[%s4288_s5 + $0x1b8] sm:$0xff] }
 0x12b   : > { %1552 = vmatpush.msrb.mxu0 %v2370_v57 }
 0x12c   : > { %1479 = vmatpush.msra.mxu2 %v2458_v39  ;;  %1606 = vmatpush.msrb.mxu3 %v628_v40  ;;  %v621_v39 = vld [vmem:[%s4288_s5 + $0x28] sm:$0xff] }
 0x12d   : > { %1553 = vmatpush.msrb.mxu0 %v2368_v61  ;;  %v2393_v40 = vld [vmem:[%s4288_s5 + $0x1a8] sm:$0xff] }
 0x12e   : > { %1480 = vmatpush.msra.mxu2 %v2457_v58  ;;  %1607 = vmatpush.msrb.mxu3 %v626_v44  ;;  %v2371_v58 = vld [vmem:[%s4288_s5 + $0xf8] sm:$0xff] }
 0x12f   : > { %v2391_v44 = vld [vmem:[%s4288_s5 + $0x198] sm:$0xff] }
 0x130   : > { %1481 = vmatpush.msra.mxu2 %v2456_v60  ;;  %1608 = vmatpush.msrb.mxu3 %v624_v48  ;;  %v619_v60 = vld [vmem:[%s4288_s5 + $0x18] sm:$0xff]  ;;  %v2388_v48 = vld [vmem:[%s4288_s5 + $0x180] sm:$0xff] }
 0x132   : > { %1482 = vmatpush.msra.mxu2 %v2455_v63  ;;  %1609 = vmatpush.msrb.mxu3 %v622_v52  ;;  %v616_v63 = vld [vmem:[%s4288_s5] sm:$0xff]  ;;  %v2386_v52 = vld [vmem:[%s4288_s5 + $0x170] sm:$0xff] }
 0x134   : > { %1483 = vmatpush.msra.mxu2 %v2454_v2  ;;  %1610 = vmatpush.msrb.mxu3 %v620_v38  ;;  %v2366_v2 = vld [vmem:[%s4288_s5 + $0xd0] sm:$0xff] }
 0x135   : > { %1554 = vmatpush.msrb.mxu0 %v2366_v2 }
 0x136   : > { %1484 = vmatpush.msra.mxu2 %v2453_v5  ;;  %1611 = vmatpush.msrb.mxu3 %v618_v59  ;;  %v2424_v5 = vld [vmem:[%s4288_s5 + $0x2a0] sm:$0xff] }
 0x137   : > { %1555 = vmatpush.msrb.mxu0 %v2364_v7 }
 0x138   : > { %1485 = vmatpush.msra.mxu2 %v2452_v8  ;;  %1612 = vmatpush.msrb.mxu3 %v616_v63  ;;  %v2365_v8 = vld [vmem:[%s4288_s5 + $0xc8] sm:$0xff] }
 0x139   : > { %1556 = vmatpush.msrb.mxu0 %v2362_v11 }
 0x13a   : > { %2599 = vmatpush.msk.msrb.mxu2 %vm1220_vm4, %v637_v19  ;;  %v2419_v19 = vld [vmem:[%s4288_s5 + $0x278] sm:$0xff] }
 0x13b   : > { %2602 = vmatpush.msk.msra.mxu0 %vm1220_vm4, %v2404_v4  ;;  %v2447_v4 = vld [vmem:[%s4288_s5 + $0x358] sm:$0xff] }
 0x13c   : > { %1626 = vmatpush.msrb.mxu2 %v635_v28  ;;  %v2396_v28 = vld [vmem:[%s4288_s5 + $0x1c0] sm:$0xff] }
 0x13e   : > { %1627 = vmatpush.msrb.mxu2 %v633_v31  ;;  %v2412_v31 = vld [vmem:[%s4288_s5 + $0x240] sm:$0xff] }
 0x140   : > { %1628 = vmatpush.msrb.mxu2 %v631_v35  ;;  %v2410_v35 = vld [vmem:[%s4288_s5 + $0x230] sm:$0xff] }
 0x142   : > { %1629 = vmatpush.msrb.mxu2 %v629_v41  ;;  %v2408_v41 = vld [vmem:[%s4288_s5 + $0x220] sm:$0xff] }
 0x144   : > { %1630 = vmatpush.msrb.mxu2 %v627_v45 }
 0x146   : > { %1631 = vmatpush.msrb.mxu2 %v625_v49  ;;  %v2389_v49 = vld [vmem:[%s4288_s5 + $0x188] sm:$0xff] }
 0x148   : > { %1632 = vmatpush.msrb.mxu2 %v623_v54  ;;  %v2387_v54 = vld [vmem:[%s4288_s5 + $0x178] sm:$0xff] }
 0x14a   : > { %1633 = vmatpush.msrb.mxu2 %v621_v39 }
 0x14c   : > { %1634 = vmatpush.msrb.mxu2 %v619_v60 }
 0x14e   : > { %1635 = vmatpush.msrb.mxu2 %v617_v0 }
 0x194   : > { %v1332_v13 = vpop.f32.mrf.mxu2  ;;  %v1355_v14 = vpop.f32.mrf.mxu3 }
 0x19c   : > { %v1335_v16 = vpop.f32.mrf.mxu2  ;;  %v1358_v17 = vpop.f32.mrf.mxu3 }
 0x1a4   : > { %v1384_v20 = vpop.f32.mrf.mxu2  ;;  %v1407_v21 = vpop.f32.mrf.mxu3 }
 0x1a5   : > { %v1413_v22 = vmax.f32 %v1332_v13, %v1384_v20  ;;  %v1414_v23 = vmax.f32 %v1355_v14, %v1407_v21  ;;  %v2405_v13 = vld [vmem:[%s4288_s5 + $0x208] sm:$0xf]  ;;  %v2420_v14 = vld [vmem:[%s4288_s5 + $0x280] sm:$0xff] }
 0x1a6   : > { %v2400_v20 = vld [vmem:[%s4288_s5 + $0x1e0] sm:$0xff]  ;;  %v2401_v21 = vld [vmem:[%s4288_s5 + $0x1e8] sm:$0xff] }
 0x1a7   : > { %1440 = vmatmul.f32.vlgmr.msrb.gmra.mxu1 %v1413_v22  ;;  %1486 = vmatmul.f32.vlgmr.msra.gmra.mxu2 %v1413_v22  ;;  %v2416_v22 = vld [vmem:[%s4288_s5 + $0x260] sm:$0xff] }
 0x1a8   : > { %2588 = vmatmul.msk.f32.vlgmr.msra.gmra.mxu3 %vm1417_vm6, %v1414_v23  ;;  %2593 = vmatpush.msk.msrb.mxu1 %vm1220_vm4, %v2383_v33  ;;  %v2394_v33 = vld [vmem:[%s4288_s5 + $0x1b0] sm:$0xff] }
 0x1a9   : > { %2608 = vmatpush.msk.msra.mxu3 %vm1220_vm4, %v2426_v53  ;;  %2611 = vmatpush.msk.msra.mxu2 %vm1220_vm4, %v2427_v1 }
 0x1aa   : > { %1570 = vmatpush.msrb.mxu1 %v2381_v37  ;;  %v2392_v37 = vld [vmem:[%s4288_s5 + $0x1a0] sm:$0xff] }
 0x1ab   : > { %1725 = vmatpush.msra.mxu3 %v2424_v5  ;;  %1748 = vmatpush.msra.mxu2 %v2425_v6 }
 0x1ac   : > { %v1387_v26 = vpop.f32.mrf.mxu2  ;;  %v1410_v27 = vpop.f32.mrf.mxu3  ;;  %1571 = vmatpush.msrb.mxu1 %v2379_v43  ;;  %v2390_v43 = vld [vmem:[%s4288_s5 + $0x190] sm:$0xff] }
 0x1ad   : > { %v1415_v30 = vmax.f32 %v1335_v16, %v1387_v26  ;;  %v1416_v24 = vmax.f32 %v1358_v17, %v1410_v27  ;;  %1726 = vmatpush.msra.mxu3 %v2422_v9  ;;  %1749 = vmatpush.msra.mxu2 %v2423_v10  ;;  %v2402_v16 = vld [vmem:[%s4288_s5 + $0x1f0] sm:$0xff]  ;;  %v2403_v17 = vld [vmem:[%s4288_s5 + $0x1f8] sm:$0xff]  ;;  %v2449_v9 = vld [vmem:[%s4288_s5 + $0x368] sm:$0xf] }
 0x1ae   : > { %1572 = vmatpush.msrb.mxu1 %v2377_v47  ;;  %1662 = vmatpush.msra.mxu0 %v2402_v16  ;;  %v2398_v26 = vld [vmem:[%s4288_s5 + $0x1d0] sm:$0xff]  ;;  %v2399_v27 = vld [vmem:[%s4288_s5 + $0x1d8] sm:$0xff] }
 0x1af   : > { %1443 = vmatmul.f32.gmra.mxu1 %v1415_v30  ;;  %1489 = vmatmul.f32.gmra.mxu2 %v1415_v30  ;;  %v2407_v47 = vld [vmem:[%s4288_s5 + $0x218] sm:$0xff] }
 0x1b0   : > { %2589 = vmatmul.msk.f32.gmra.mxu3 %vm1417_vm6, %v1416_v24  ;;  %1573 = vmatpush.msrb.mxu1 %v2375_v51 }
 0x1b1   : > { %1727 = vmatpush.msra.mxu3 %v2420_v14  ;;  %1750 = vmatpush.msra.mxu2 %v2421_v15  ;;  %v2444_v14 = vld [vmem:[%s4288_s5 + $0x340] sm:$0xff]  ;;  %v2445_v15 = vld [vmem:[%s4288_s5 + $0x348] sm:$0xff] }
 0x1b2   : > { %1574 = vmatpush.msrb.mxu1 %v2373_v56  ;;  %1663 = vmatpush.msra.mxu0 %v2400_v20  ;;  %v2385_v56 = vld [vmem:[%s4288_s5 + $0x168] sm:$0xff] }
 0x1b3   : > { %1728 = vmatpush.msra.mxu3 %v2418_v18  ;;  %1751 = vmatpush.msra.mxu2 %v2419_v19  ;;  %v2443_v18 = vld [vmem:[%s4288_s5 + $0x338] sm:$0xff]  ;;  %v2440_v19 = vld [vmem:[%s4288_s5 + $0x320] sm:$0xff]  ;;  %v2441_v20 = vld [vmem:[%s4288_s5 + $0x328] sm:$0xff] }
 0x1b4   : > { %1575 = vmatpush.msrb.mxu1 %v2371_v58  ;;  %1664 = vmatpush.msra.mxu0 %v2398_v26  ;;  %v2680_v58 = vld [vmem:[%s4285_s2] ss:$0 sm:$0xff] }
 0x1b5   : > { %1729 = vmatpush.msra.mxu3 %v2416_v22  ;;  %v2438_v22 = vld [vmem:[%s4288_s5 + $0x310] sm:$0xff] }
 0x1b6   : > { %1576 = vmatpush.msrb.mxu1 %v2369_v62  ;;  %1665 = vmatpush.msra.mxu0 %v2396_v28  ;;  %v2435_v28 = vld [vmem:[%s4288_s5 + $0x2f8] sm:$0xff] }
 0x1b7   : > { %2586 = vmatmul.msk.f32.vlgmr.msra.gmra.mxu1 %vm1417_vm6, %v1414_v23  ;;  %v2417_v23 = vld [vmem:[%s4288_s5 + $0x268] sm:$0xff] }
 0x1b8   : > { %1577 = vmatpush.msrb.mxu1 %v2367_v3  ;;  %1752 = vmatpush.msra.mxu2 %v2417_v23  ;;  %v2439_v23 = vld [vmem:[%s4288_s5 + $0x318] sm:$0xff] }
 0x1b9   : > { %1666 = vmatpush.msra.mxu0 %v2394_v33  ;;  %v2431_v33 = vld [vmem:[%s4288_s5 + $0x2d8] sm:$0xff] }
 0x1ba   : > { %1578 = vmatpush.msrb.mxu1 %v2365_v8  ;;  %1753 = vmatpush.msra.mxu2 %v2415_v25  ;;  %v2448_v8 = vld [vmem:[%s4288_s5 + $0x360] sm:$0xf]  ;;  %v2434_v25 = vld [vmem:[%s4288_s5 + $0x2f0] sm:$0xff] }
 0x1bb   : > { %1667 = vmatpush.msra.mxu0 %v2392_v37 }
 0x1bc   : > { %1579 = vmatpush.msrb.mxu1 %v2363_v12  ;;  %1754 = vmatpush.msra.mxu2 %v2413_v32  ;;  %v2446_v12 = vld [vmem:[%s4288_s5 + $0x350] sm:$0xff] }
 0x1bd   : > { %1668 = vmatpush.msra.mxu0 %v2390_v43  ;;  %v2430_v32 = vld [vmem:[%s4288_s5 + $0x2d0] sm:$0xff] }
 0x1be   : > { %2605 = vmatpush.msk.msra.mxu1 %vm1220_vm4, %v2405_v13  ;;  %1755 = vmatpush.msra.mxu2 %v2411_v36 }
 0x1bf   : > { %2587 = vmatmul.msk.f32.gmra.mxu1 %vm1417_vm6, %v1416_v24  ;;  %v2414_v24 = vld [vmem:[%s4288_s5 + $0x250] sm:$0xff]  ;;  %1669 = vmatpush.msra.mxu0 %v2388_v48 }
 0x1c0   : > { %1685 = vmatpush.msra.mxu1 %v2403_v17  ;;  %1730 = vmatpush.msra.mxu3 %v2414_v24  ;;  %v2442_v17 = vld [vmem:[%s4288_s5 + $0x330] sm:$0xff] }
 0x1c1   : > { %1756 = vmatpush.msra.mxu2 %v2409_v42  ;;  %1670 = vmatpush.msra.mxu0 %v2386_v52 }
 0x1c2   : > { %1686 = vmatpush.msra.mxu1 %v2401_v21  ;;  %1731 = vmatpush.msra.mxu3 %v2412_v31  ;;  %v2433_v31 = vld [vmem:[%s4288_s5 + $0x2e8] sm:$0xff] }
 0x1c3   : > { %1757 = vmatpush.msra.mxu2 %v2407_v47  ;;  %1671 = vmatpush.msra.mxu0 %v2384_v55  ;;  %v796_v55 = vld [vmem:[%s4291_s8 + $0x78] sm:$0xff] }
 0x1c4   : > { %1687 = vmatpush.msra.mxu1 %v2399_v27  ;;  %1732 = vmatpush.msra.mxu3 %v2410_v35  ;;  %v2436_v27 = vld [vmem:[%s4288_s5 + $0x300] sm:$0xff]  ;;  %v2429_v35 = vld [vmem:[%s4288_s5 + $0x2c8] sm:$0xff] }
 0x1c6   : > { %1688 = vmatpush.msra.mxu1 %v2397_v29  ;;  %1733 = vmatpush.msra.mxu3 %v2408_v41  ;;  %v2432_v29 = vld [vmem:[%s4288_s5 + $0x2e0] sm:$0xff] }
 0x1c8   : > { %1689 = vmatpush.msra.mxu1 %v2395_v34  ;;  %1734 = vmatpush.msra.mxu3 %v2406_v46  ;;  %v2428_v34 = vld [vmem:[%s4288_s5 + $0x2c0] sm:$0xff] }
 0x1ca   : > { %1690 = vmatpush.msra.mxu1 %v2393_v40 }
 0x1cc   : > { %1691 = vmatpush.msra.mxu1 %v2391_v44 }
 0x1ce   : > { %1692 = vmatpush.msra.mxu1 %v2389_v49 }
 0x1d0   : > { %1693 = vmatpush.msra.mxu1 %v2387_v54 }
 0x1d2   : > { %1694 = vmatpush.msra.mxu1 %v2385_v56  ;;  %v795_v56 = vld [vmem:[%s4291_s8 + $0x70] sm:$0xff] }
 0x224   : > { %v1441_v30 = vpop.f32.mrf.mxu1 }
 0x22a   : > { %v1487_v50 = vpop.f32.mrf.mxu2 }
 0x22b   : > { %v1510_v51 = vpop.f32.mrf.mxu3 }
 0x22c   : > { %v1444_v45 = vpop.f32.mrf.mxu1  ;;  %v1511_v39 = vadd.f32 %v1510_v51, %v1487_v50 }
 0x232   : > { %v1490_v61 = vpop.f32.mrf.mxu2 }
 0x233   : > { %v1513_v62 = vpop.f32.mrf.mxu3 }
 0x234   : > { %v1464_v38 = vpop.f32.mrf.mxu1  ;;  %v1514_v53 = vadd.f32 %v1513_v62, %v1490_v61 }
 0x235   : > { %v1465_v57 = vadd.f32 %v1464_v38, %v1441_v30  ;;  %v2437_v30 = vld [vmem:[%s4288_s5 + $0x308] sm:$0xff] }
 0x237   : > { %v1516_v59 = vmax.f32 %v1465_v57, %v1511_v39 }
 0x239   : > { %v1521_v60 = vadd.f32 %v2680_v58, %v1516_v59 }
 0x23b   : > { %v3767_v63 = vmax.f32 %v1521_v60, 0.0  ;;  %v793_v60 = vld [vmem:[%s4291_s8 + $0x60] sm:$0xff] }
 0x23c   : > { %v1467_v0 = vpop.f32.mrf.mxu1 }
 0x23d   : > { %v1468_v1 = vadd.f32 %v1467_v0, %v1444_v45  ;;  %2597 = vmatmul.msk.f32.vlgmr.msrb.gmra.mxu3 %vm1530_vm7, %v3767_v63  ;;  %2600 = vmatmul.msk.f32.vlgmr.msrb.gmra.mxu2 %vm1530_vm7, %v3767_v63  ;;  %v1527_v6 = vrot.slane %v3767_v63, 1  ;;  %v1706_v13 = vrot.slane %v3767_v63, 3  ;;  %v1643_v26 = vrot.slane %v3767_v63, 2 }
 0x23e   : > { %v1769_v37 = vrot.slane %v3767_v63, 4  ;;  %v792_v63 = vld [vmem:[%s4291_s8 + $0x58] sm:$0xff] }
 0x23f   : > { %v1517_v2 = vmax.f32 %v1468_v1, %v1514_v53 }
 0x241   : > { %v1522_v3 = vadd.f32 %v2680_v58, %v1517_v2  ;;  %v794_v58 = vld [vmem:[%s4291_s8 + $0x68] sm:$0xff]  ;;  %v791_v2 = vld [vmem:[%s4291_s8 + $0x50] sm:$0xff] }
 0x243   : > { %v3773_v5 = vmax.f32 %v1522_v3, 0.0 }
 0x245   : > { %2598 = vmatmul.msk.f32.gmra.mxu3 %vm1530_vm7, %v3773_v5  ;;  %2601 = vmatmul.msk.f32.gmra.mxu2 %vm1530_vm7, %v3773_v5  ;;  %v1528_v7 = vrot.slane %v3773_v5, 1  ;;  %v1707_v11 = vrot.slane %v3773_v5, 3  ;;  %v1644_v21 = vrot.slane %v3773_v5, 2  ;;  %v1770_v36 = vrot.slane %v3773_v5, 4 }
 0x247   : > { %v1529_v10 = vsel %vm915_vm0, %v1527_v6, %v1528_v7  ;;  %v1708_v16 = vsel %vm1138_vm3, %v1706_v13, %v1707_v11  ;;  %v1645_v24 = vsel %vm1056_vm2, %v1643_v26, %v1644_v21  ;;  %v1771_v40 = vsel %vm1220_vm4, %v1769_v37, %v1770_v36  ;;  %v2485_v26 = vld [vmem:[%s4291_s8 + $0xf8] sm:$0xff] }
 0x248   : > { %2591 = vmatmul.msk.f32.vlgmr.msrb.gmra.mxu0 %vm1530_vm7, %v1529_v10  ;;  %2594 = vmatmul.msk.f32.vlgmr.msrb.gmra.mxu1 %vm1530_vm7, %v1529_v10  ;;  %v784_v37 = vld [vmem:[%s4291_s8 + $0x18] sm:$0xff] }
 0x249   : > { %2614 = vmatpush.msk.msrb.mxu0 %vm1220_vm4, %v2448_v8  ;;  %2617 = vmatpush.msk.msrb.mxu1 %vm1220_vm4, %v2449_v9 }
 0x24b   : > { %1788 = vmatpush.msrb.mxu0 %v2446_v12  ;;  %1811 = vmatpush.msrb.mxu1 %v2447_v4 }
 0x24d   : > { %2609 = vmatmul.msk.f32.vlgmr.msra.gmra.mxu3 %vm1530_vm7, %v1708_v16  ;;  %2612 = vmatmul.msk.f32.vlgmr.msra.gmra.mxu2 %vm1530_vm7, %v1708_v16  ;;  %v2473_v16 = vld [vmem:[%s4290_s7 + $0x8] sm:$0x1f] }
 0x24e   : > { %1789 = vmatpush.msrb.mxu0 %v2444_v14  ;;  %1812 = vmatpush.msrb.mxu1 %v2445_v15  ;;  %v778_v15 = vld [vmem:[%s4290_s7] sm:$0x1f] }
 0x250   : > { %2592 = vmatmul.msk.f32.gmra.mxu0 %vm1530_vm7, %v1528_v7  ;;  %2595 = vmatmul.msk.f32.gmra.mxu1 %vm1530_vm7, %v1528_v7 }
 0x251   : > { %1790 = vmatpush.msrb.mxu0 %v2442_v17  ;;  %1813 = vmatpush.msrb.mxu1 %v2443_v18  ;;  %v2489_v17 = vld [vmem:[%s4291_s8 + $0x118] sm:$0xff] }
 0x253   : > { %1791 = vmatpush.msrb.mxu0 %v2440_v19  ;;  %1814 = vmatpush.msrb.mxu1 %v2441_v20  ;;  %v2488_v20 = vld [vmem:[%s4291_s8 + $0x110] sm:$0xff] }
 0x255   : > { %2610 = vmatmul.msk.f32.gmra.mxu3 %vm1530_vm7, %v1707_v11  ;;  %2613 = vmatmul.msk.f32.gmra.mxu2 %vm1530_vm7, %v1707_v11  ;;  %v790_v11 = vld [vmem:[%s4291_s8 + $0x48] sm:$0xff] }
 0x256   : > { %1792 = vmatpush.msrb.mxu0 %v2438_v22  ;;  %1815 = vmatpush.msrb.mxu1 %v2439_v23  ;;  %v2487_v22 = vld [vmem:[%s4291_s8 + $0x108] sm:$0xff]  ;;  %v2486_v23 = vld [vmem:[%s4291_s8 + $0x100] sm:$0xff] }
 0x258   : > { %2603 = vmatmul.msk.f32.vlgmr.msra.gmra.mxu0 %vm1530_vm7, %v1645_v24  ;;  %2606 = vmatmul.msk.f32.vlgmr.msra.gmra.mxu1 %vm1530_vm7, %v1645_v24  ;;  %v789_v24 = vld [vmem:[%s4291_s8 + $0x40] sm:$0xff] }
 0x259   : > { %1793 = vmatpush.msrb.mxu0 %v2436_v27  ;;  %1816 = vmatpush.msrb.mxu1 %v2437_v30  ;;  %v2484_v27 = vld [vmem:[%s4291_s8 + $0xf0] sm:$0xff]  ;;  %v2483_v30 = vld [vmem:[%s4291_s8 + $0xe8] sm:$0xff] }
 0x25b   : > { %1794 = vmatpush.msrb.mxu0 %v2434_v25  ;;  %1817 = vmatpush.msrb.mxu1 %v2435_v28  ;;  %v2482_v25 = vld [vmem:[%s4291_s8 + $0xe0] sm:$0xff]  ;;  %v788_v28 = vld [vmem:[%s4291_s8 + $0x38] sm:$0xff] }
 0x25d   : > { %1795 = vmatpush.msrb.mxu0 %v2432_v29  ;;  %1818 = vmatpush.msrb.mxu1 %v2433_v31  ;;  %v2481_v29 = vld [vmem:[%s4291_s8 + $0xd8] sm:$0xff]  ;;  %v787_v31 = vld [vmem:[%s4291_s8 + $0x30] sm:$0xff] }
 0x25f   : > { %1796 = vmatpush.msrb.mxu0 %v2430_v32  ;;  %1819 = vmatpush.msrb.mxu1 %v2431_v33  ;;  %v2480_v32 = vld [vmem:[%s4291_s8 + $0xd0] sm:$0xff]  ;;  %v786_v33 = vld [vmem:[%s4291_s8 + $0x28] sm:$0xff] }
 0x260   : > { %2604 = vmatmul.msk.f32.gmra.mxu0 %vm1530_vm7, %v1644_v21  ;;  %2607 = vmatmul.msk.f32.gmra.mxu1 %vm1530_vm7, %v1644_v21 }
 0x261   : > { %1797 = vmatpush.msrb.mxu0 %v2428_v34  ;;  %1820 = vmatpush.msrb.mxu1 %v2429_v35  ;;  %v2479_v34 = vld [vmem:[%s4291_s8 + $0xc8] sm:$0xff]  ;;  %v785_v35 = vld [vmem:[%s4291_s8 + $0x20] sm:$0xff] }
 0x263   : > { %1932 = vmatpush.msra.mxu0 %v796_v55  ;;  %v797_v55 = vld [vmem:[%s4291_s8 + $0x80] sm:$0xff] }
 0x265   : > { %1933 = vmatpush.msra.mxu0 %v795_v56  ;;  %v833_v56 = vld [vmem:[%s4292_s9 + $0x48] sm:$0xff] }
 0x267   : > { %1934 = vmatpush.msra.mxu0 %v794_v58  ;;  %v831_v58 = vld [vmem:[%s4292_s9 + $0x38] sm:$0xff] }
 0x268   : > { %2615 = vmatmul.msk.f32.vlgmr.msrb.gmra.mxu0 %vm1530_vm7, %v1771_v40  ;;  %2618 = vmatmul.msk.f32.vlgmr.msrb.gmra.mxu1 %vm1530_vm7, %v1771_v40  ;;  %v2477_v40 = vld [vmem:[%s4291_s8 + $0xb8] sm:$0xff] }
 0x269   : > { %1935 = vmatpush.msra.mxu0 %v793_v60  ;;  %v830_v60 = vld [vmem:[%s4292_s9 + $0x30] sm:$0xff] }
 0x26b   : > { %1936 = vmatpush.msra.mxu0 %v792_v63  ;;  %v2499_v63 = vld [vmem:[%s4292_s9 + $0x78] sm:$0xff] }
 0x26d   : > { %1937 = vmatpush.msra.mxu0 %v791_v2 }
 0x26f   : > { %1938 = vmatpush.msra.mxu0 %v790_v11  ;;  %v2496_v11 = vld [vmem:[%s4292_s9 + $0x60] sm:$0xff] }
 0x270   : > { %2616 = vmatmul.msk.f32.gmra.mxu0 %vm1530_vm7, %v1770_v36  ;;  %2619 = vmatmul.msk.f32.gmra.mxu1 %vm1530_vm7, %v1770_v36  ;;  %v2478_v36 = vld [vmem:[%s4291_s8 + $0xc0] sm:$0xff] }
 0x271   : > { %1939 = vmatpush.msra.mxu0 %v789_v24  ;;  %v2530_v24 = vld [vmem:[%s4292_s9 + $0x170] sm:$0xff] }
 0x273   : > { %1940 = vmatpush.msra.mxu0 %v788_v28  ;;  %v2520_v28 = vld [vmem:[%s4292_s9 + $0x120] sm:$0xff] }
 0x275   : > { %1941 = vmatpush.msra.mxu0 %v787_v31  ;;  %v2506_v31 = vld [vmem:[%s4292_s9 + $0xb0] sm:$0xff] }
 0x277   : > { %1942 = vmatpush.msra.mxu0 %v786_v33  ;;  %v2528_v33 = vld [vmem:[%s4292_s9 + $0x160] sm:$0xff] }
 0x279   : > { %1943 = vmatpush.msra.mxu0 %v785_v35  ;;  %v2518_v35 = vld [vmem:[%s4292_s9 + $0x110] sm:$0xff] }
 0x27b   : > { %1944 = vmatpush.msra.mxu0 %v784_v37  ;;  %v2504_v37 = vld [vmem:[%s4292_s9 + $0xa0] sm:$0xff] }
 0x2c0   : > { %v1614_v43 = vpop.f32.mrf.mxu3  ;;  %v1637_v46 = vpop.f32.mrf.mxu2 }
 0x2c5   : > { %v1558_v41 = vpop.f32.mrf.mxu0  ;;  %v1581_v42 = vpop.f32.mrf.mxu1 }
 0x2c6   : > { %v1615_v61 = vadd.f32 %v1614_v43, %v1558_v41  ;;  %v1638_v3 = vadd.f32 %v1637_v46, %v1581_v42  ;;  %v783_v41 = vld [vmem:[%s4291_s8 + $0x10] sm:$0xff]  ;;  %v782_v43 = vld [vmem:[%s4291_s8 + $0x8] sm:$0xff]  ;;  %v2474_v46 = vld [vmem:[%s4291_s8 + $0xa0] sm:$0xff] }
 0x2c7   : > { %v2476_v42 = vld [vmem:[%s4291_s8 + $0xb0] sm:$0xff]  ;;  %1945 = vmatpush.msra.mxu0 %v783_v41 }
 0x2c8   : > { %v1617_v49 = vpop.f32.mrf.mxu3  ;;  %v1640_v50 = vpop.f32.mrf.mxu2  ;;  %v2526_v41 = vld [vmem:[%s4292_s9 + $0x150] sm:$0xff] }
 0x2c9   : > { %1946 = vmatpush.msra.mxu0 %v782_v43  ;;  %v2525_v43 = vld [vmem:[%s4292_s9 + $0x148] sm:$0xff] }
 0x2cd   : > { %v1561_v44 = vpop.f32.mrf.mxu0  ;;  %v1584_v45 = vpop.f32.mrf.mxu1 }
 0x2ce   : > { %v1618_v59 = vadd.f32 %v1617_v49, %v1561_v44  ;;  %v1641_v0 = vadd.f32 %v1640_v50, %v1584_v45  ;;  %v2475_v44 = vld [vmem:[%s4291_s8 + $0xa8] sm:$0xff]  ;;  %v781_v45 = vld [vmem:[%s4291_s8] sm:$0xff]  ;;  %v800_v49 = vld [vmem:[%s4291_s8 + $0x98] sm:$0xff] }
 0x2cf   : > { %1947 = vmatpush.msra.mxu0 %v781_v45  ;;  %v799_v50 = vld [vmem:[%s4291_s8 + $0x90] sm:$0xff]  ;;  %v2524_v45 = vld [vmem:[%s4292_s9 + $0x140] sm:$0xff] }
 0x2d0   : > { %v1736_v54 = vpop.f32.mrf.mxu3  ;;  %v1759_v38 = vpop.f32.mrf.mxu2 }
 0x2d1   : > { %1964 = vmatpush.msrb.mxu0 %v800_v49  ;;  %v891_v49 = vld [vmem:[%s4294_s11 + $0x60] sm:$0xff] }
 0x2d3   : > { %1965 = vmatpush.msrb.mxu0 %v799_v50 }
 0x2d5   : > { %v1673_v47 = vpop.f32.mrf.mxu0  ;;  %v1696_v48 = vpop.f32.mrf.mxu1 }
 0x2d6   : > { %v1702_v53 = vadd.f32 %v1673_v47, %v1615_v61  ;;  %v1703_v8 = vadd.f32 %v1696_v48, %v1638_v3  ;;  %v2493_v47 = vld [vmem:[%s4291_s8 + $0x138] sm:$0xff]  ;;  %v2492_v48 = vld [vmem:[%s4291_s8 + $0x130] sm:$0xff]  ;;  %v2500_v61 = vld [vmem:[%s4292_s9 + $0x80] sm:$0xff] }
 0x2d8   : > { %v1739_v1 = vpop.f32.mrf.mxu3  ;;  %v1765_v9 = vadd.f32 %v1736_v54, %v1702_v53  ;;  %v1762_v12 = vpop.f32.mrf.mxu2  ;;  %v1766_v18 = vadd.f32 %v1759_v38, %v1703_v8  ;;  %v2490_v54 = vld [vmem:[%s4291_s8 + $0x120] sm:$0xff]  ;;  %v2503_v38 = vld [vmem:[%s4292_s9 + $0x98] sm:$0xff]  ;;  %v2498_v53 = vld [vmem:[%s4292_s9 + $0x70] sm:$0xff] }
 0x2d9   : > { %2029 = vmatpush.msra.mxu1 %v2503_v38 }
 0x2dd   : > { %v1676_v51 = vpop.f32.mrf.mxu0  ;;  %v1699_v52 = vpop.f32.mrf.mxu1 }
 0x2de   : > { %v1704_v62 = vadd.f32 %v1676_v51, %v1618_v59  ;;  %v1705_v5 = vadd.f32 %v1699_v52, %v1641_v0  ;;  %v2491_v51 = vld [vmem:[%s4291_s8 + $0x128] sm:$0xff]  ;;  %v828_v0 = vld [vmem:[%s4292_s9 + $0x20] sm:$0xff] }
 0x2df   : > { %v798_v52 = vld [vmem:[%s4291_s8 + $0x88] sm:$0xff] }
 0x2e0   : > { %v1767_v6 = vadd.f32 %v1739_v1, %v1704_v62  ;;  %v1768_v14 = vadd.f32 %v1762_v12, %v1705_v5  ;;  %1966 = vmatpush.msrb.mxu0 %v798_v52  ;;  %v2501_v59 = vld [vmem:[%s4292_s9 + $0x88] sm:$0xff]  ;;  %v827_v1 = vld [vmem:[%s4292_s9 + $0x18] sm:$0xff]  ;;  %v889_v52 = vld [vmem:[%s4294_s11 + $0x50] sm:$0xff] }
 0x2e1   : > { %v829_v62 = vld [vmem:[%s4292_s9 + $0x28] sm:$0xff] }
 0x2e2   : > { %1967 = vmatpush.msrb.mxu0 %v797_v55  ;;  %v825_v12 = vld [vmem:[%s4292_s9 + $0x8] sm:$0xff] }
 0x2e5   : > { %v1799_v39 = vpop.f32.mrf.mxu0  ;;  %v1822_v57 = vpop.f32.mrf.mxu1 }
 0x2e6   : > { %v1828_v13 = vadd.f32 %v1799_v39, %v1765_v9  ;;  %v1829_v21 = vadd.f32 %v1822_v57, %v1766_v18  ;;  %v832_v39 = vld [vmem:[%s4292_s9 + $0x40] sm:$0xff]  ;;  %v2502_v57 = vld [vmem:[%s4292_s9 + $0x90] sm:$0xff]  ;;  %v2497_v9 = vld [vmem:[%s4292_s9 + $0x68] sm:$0xff] }
 0x2e7   : > { %2030 = vmatpush.msra.mxu1 %v2502_v57  ;;  %v2494_v18 = vld [vmem:[%s4292_s9 + $0x50] sm:$0xff]  ;;  %v2681_v57 = vld [vmem:[%s4289_s6] ss:$0 sm:$0xff] }
 0x2e9   : > { %2031 = vmatpush.msra.mxu1 %v2501_v59 }
 0x2eb   : > { %2032 = vmatpush.msra.mxu1 %v2500_v61 }
 0x2ed   : > { %v1802_v7 = vpop.f32.mrf.mxu0  ;;  %v1825_v4 = vpop.f32.mrf.mxu1  ;;  %2033 = vmatpush.msra.mxu1 %v2499_v63 }
 0x2ee   : > { %v1830_v10 = vadd.f32 %v1802_v7, %v1767_v6  ;;  %v1831_v19 = vadd.f32 %v1825_v4, %v1768_v14  ;;  %v2513_v4 = vld [vmem:[%s4292_s9 + $0xe8] sm:$0xff]  ;;  %v824_v14 = vld [vmem:[%s4292_s9] sm:$0xff] }
 0x2ef   : > { %2034 = vmatpush.msra.mxu1 %v2498_v53  ;;  %v888_v53 = vld [vmem:[%s4294_s11 + $0x48] sm:$0xff] }
 0x2f0   : > { %2620 = vmatpush.msk.msrb.mxu3 %vm1836_vm8, %v1830_v10  ;;  %2624 = vmatpush.msk.msrb.mxu2 %vm1836_vm8, %v1830_v10  ;;  %v826_v10 = vld [vmem:[%s4292_s9 + $0x10] sm:$0xff] }
 0x2f1   : > { %2035 = vmatpush.msra.mxu1 %v2497_v9  ;;  %v880_v9 = vld [vmem:[%s4294_s11 + $0x8] sm:$0xff] }
 0x2f2   : > { %1858 = vmatpush.msrb.mxu3 %v1828_v13  ;;  %1901 = vmatpush.msrb.mxu2 %v1828_v13  ;;  %v2495_v13 = vld [vmem:[%s4292_s9 + $0x58] sm:$0xff] }
 0x2f3   : > { %2621 = vmatmul.msk.f32.vlgmr.msrb.gmra.mxu3 %vm1832_vm9, %v778_v15  ;;  %2625 = vmatmul.msk.f32.vlgmr.msrb.gmra.mxu2 %vm1832_vm9, %v2473_v16 }
 0x2f4   : > { %2622 = vmatpush.msk.msra.mxu3 %vm1836_vm8, %v1831_v19  ;;  %1972 = vmatpush.msra.mxu2 %v2489_v17  ;;  %v2511_v17 = vld [vmem:[%s4292_s9 + $0xd8] sm:$0xff] }
 0x2f5   : > { %2036 = vmatpush.msra.mxu1 %v2496_v11  ;;  %v905_v11 = vld [vmem:[%s4296_s13 + $0x50] sm:$0xf] }
 0x2f6   : > { %1878 = vmatpush.msra.mxu3 %v1829_v21  ;;  %1973 = vmatpush.msra.mxu2 %v2488_v20  ;;  %v2523_v20 = vld [vmem:[%s4292_s9 + $0x138] sm:$0xff] }
 0x2f7   : > { %2037 = vmatpush.msra.mxu1 %v2495_v13  ;;  %v902_v13 = vld [vmem:[%s4296_s13 + $0x38] sm:$0xff] }
 0x2f8   : > { %2626 = vmatpush.msk.msrb.mxu3 %vm1836_vm8, %v1831_v19  ;;  %1974 = vmatpush.msra.mxu2 %v2487_v22  ;;  %v2510_v19 = vld [vmem:[%s4292_s9 + $0xd0] sm:$0xff]  ;;  %v2509_v22 = vld [vmem:[%s4292_s9 + $0xc8] sm:$0xff] }
 0x2f9   : > { %2038 = vmatpush.msra.mxu1 %v2494_v18 }
 0x2fa   : > { %1921 = vmatpush.msrb.mxu3 %v1829_v21  ;;  %1975 = vmatpush.msra.mxu2 %v2486_v23  ;;  %v2532_v21 = vld [vmem:[%s4292_s9 + $0x180] sm:$0xff]  ;;  %v2522_v23 = vld [vmem:[%s4292_s9 + $0x130] sm:$0xff] }
 0x2fb   : > { %2623 = vmatmul.msk.f32.vlgmr.msra.gmra.mxu3 %vm1832_vm9, %v778_v15  ;;  %v2512_v15 = vld [vmem:[%s4292_s9 + $0xe0] sm:$0xff]  ;;  %2098 = vmatpush.msrb.mxu1 %v2523_v20 }
 0x2fc   : > { %1976 = vmatpush.msra.mxu2 %v2485_v26  ;;  %2004 = vmatpush.msra.mxu3 %v2493_v47  ;;  %v2531_v26 = vld [vmem:[%s4292_s9 + $0x178] sm:$0xff]  ;;  %v893_v47 = vld [vmem:[%s4294_s11 + $0x70] sm:$0xff] }
 0x2fd   : > { %2099 = vmatpush.msrb.mxu1 %v2522_v23 }
 0x2fe   : > { %1977 = vmatpush.msra.mxu2 %v2484_v27  ;;  %2005 = vmatpush.msra.mxu3 %v2492_v48  ;;  %v2508_v27 = vld [vmem:[%s4292_s9 + $0xc0] sm:$0xff]  ;;  %v892_v48 = vld [vmem:[%s4294_s11 + $0x68] sm:$0xff] }
 0x300   : > { %1978 = vmatpush.msra.mxu2 %v2483_v30  ;;  %2006 = vmatpush.msra.mxu3 %v2491_v51  ;;  %v2521_v30 = vld [vmem:[%s4292_s9 + $0x128] sm:$0xff]  ;;  %v890_v51 = vld [vmem:[%s4294_s11 + $0x58] sm:$0xff] }
 0x301   : > { %2100 = vmatpush.msrb.mxu1 %v2521_v30 }
 0x302   : > { %1979 = vmatpush.msra.mxu2 %v2482_v25  ;;  %2007 = vmatpush.msra.mxu3 %v2490_v54  ;;  %v2507_v25 = vld [vmem:[%s4292_s9 + $0xb8] sm:$0xff] }
 0x303   : > { %2627 = vmatmul.msk.f32.vlgmr.msrb.gmra.mxu3 %vm1832_vm9, %v2473_v16  ;;  %v2533_v16 = vld [vmem:[%s4292_s9 + $0x188] sm:$0xff]  ;;  %2101 = vmatpush.msrb.mxu1 %v2520_v28 }
 0x304   : > { %1980 = vmatpush.msra.mxu2 %v2481_v29  ;;  %2051 = vmatpush.msrb.mxu3 %v833_v56  ;;  %v2529_v29 = vld [vmem:[%s4292_s9 + $0x168] sm:$0xff] }
 0x306   : > { %1981 = vmatpush.msra.mxu2 %v2480_v32  ;;  %2052 = vmatpush.msrb.mxu3 %v832_v39  ;;  %v2519_v32 = vld [vmem:[%s4292_s9 + $0x118] sm:$0xff] }
 0x307   : > { %2102 = vmatpush.msrb.mxu1 %v2519_v32  ;;  %v895_v32 = vld [vmem:[%s4296_s13] sm:$0xff] }
 0x308   : > { %1982 = vmatpush.msra.mxu2 %v2479_v34  ;;  %2053 = vmatpush.msrb.mxu3 %v831_v58  ;;  %v2505_v34 = vld [vmem:[%s4292_s9 + $0xa8] sm:$0xff] }
 0x309   : > { %2103 = vmatpush.msrb.mxu1 %v2518_v35 }
 0x30a   : > { %1983 = vmatpush.msra.mxu2 %v2478_v36  ;;  %2054 = vmatpush.msrb.mxu3 %v830_v60  ;;  %v2527_v36 = vld [vmem:[%s4292_s9 + $0x158] sm:$0xff] }
 0x30c   : > { %1984 = vmatpush.msra.mxu2 %v2477_v40  ;;  %2055 = vmatpush.msrb.mxu3 %v829_v62  ;;  %v2517_v40 = vld [vmem:[%s4292_s9 + $0x108] sm:$0xff] }
 0x30d   : > { %2104 = vmatpush.msrb.mxu1 %v2517_v40 }
 0x30e   : > { %1985 = vmatpush.msra.mxu2 %v2476_v42  ;;  %2056 = vmatpush.msrb.mxu3 %v828_v0  ;;  %v2516_v42 = vld [vmem:[%s4292_s9 + $0x100] sm:$0xff] }
 0x30f   : > { %2105 = vmatpush.msrb.mxu1 %v2516_v42 }
 0x310   : > { %1986 = vmatpush.msra.mxu2 %v2475_v44  ;;  %2057 = vmatpush.msrb.mxu3 %v827_v1  ;;  %v2515_v44 = vld [vmem:[%s4292_s9 + $0xf8] sm:$0xff]  ;;  %v887_v1 = vld [vmem:[%s4294_s11 + $0x40] sm:$0xff] }
 0x311   : > { %2106 = vmatpush.msrb.mxu1 %v2515_v44 }
 0x312   : > { %1987 = vmatpush.msra.mxu2 %v2474_v46  ;;  %2058 = vmatpush.msrb.mxu3 %v826_v10  ;;  %v2514_v46 = vld [vmem:[%s4292_s9 + $0xf0] sm:$0xff]  ;;  %v879_v10 = vld [vmem:[%s4294_s11] sm:$0xff] }
 0x313   : > { %2107 = vmatpush.msrb.mxu1 %v2514_v46 }
 0x314   : > { %2059 = vmatpush.msrb.mxu3 %v825_v12  ;;  %2144 = vmatpush.msrb.mxu2 %v893_v47  ;;  %v904_v12 = vld [vmem:[%s4296_s13 + $0x48] sm:$0xff] }
 0x316   : > { %2060 = vmatpush.msrb.mxu3 %v824_v14  ;;  %2145 = vmatpush.msrb.mxu2 %v892_v48  ;;  %v901_v14 = vld [vmem:[%s4296_s13 + $0x30] sm:$0xff] }
 0x318   : > { %2146 = vmatpush.msrb.mxu2 %v891_v49 }
 0x31a   : > { %2147 = vmatpush.msrb.mxu2 %v890_v51 }
 0x31c   : > { %2148 = vmatpush.msrb.mxu2 %v889_v52 }
 0x31e   : > { %2149 = vmatpush.msrb.mxu2 %v888_v53 }
 0x320   : > { %2150 = vmatpush.msrb.mxu2 %v887_v1 }
 0x376   : > { %v1860_v2 = vpop.f32.mrf.mxu3  ;;  %v1903_v3 = vpop.f32.mrf.mxu2 }
 0x377   : > { %v1926_v5 = vmax.f32 %v1860_v2, %v1903_v3  ;;  %v886_v2 = vld [vmem:[%s4294_s11 + $0x38] sm:$0xff]  ;;  %v885_v3 = vld [vmem:[%s4294_s11 + $0x30] sm:$0xff] }
 0x378   : > { %2151 = vmatpush.msrb.mxu2 %v886_v2 }
 0x379   : > { %1948 = vmatmul.f32.vlgmr.msra.gmra.mxu0 %v1926_v5  ;;  %1988 = vmatmul.f32.vlgmr.msra.gmra.mxu2 %v1926_v5  ;;  %v884_v5 = vld [vmem:[%s4294_s11 + $0x28] sm:$0xff] }
 0x37a   : > { %2074 = vmatpush.msra.mxu0 %v2513_v4  ;;  %2152 = vmatpush.msrb.mxu2 %v885_v3  ;;  %v903_v4 = vld [vmem:[%s4296_s13 + $0x40] sm:$0xff] }
 0x37c   : > { %2075 = vmatpush.msra.mxu0 %v2512_v15  ;;  %2153 = vmatpush.msrb.mxu2 %v884_v5  ;;  %v900_v15 = vld [vmem:[%s4296_s13 + $0x28] sm:$0xff] }
 0x37e   : > { %v1880_v6 = vpop.f32.mrf.mxu3  ;;  %2076 = vmatpush.msra.mxu0 %v2511_v17  ;;  %v898_v17 = vld [vmem:[%s4296_s13 + $0x18] sm:$0xff] }
 0x380   : > { %2077 = vmatpush.msra.mxu0 %v2510_v19 }
 0x382   : > { %2078 = vmatpush.msra.mxu0 %v2509_v22 }
 0x384   : > { %2079 = vmatpush.msra.mxu0 %v2508_v27  ;;  %v878_v27 = vld [vmem:[%s4293_s10] sm:$0x1] }
 0x386   : > { %v1923_v7 = vpop.f32.mrf.mxu3  ;;  %2080 = vmatpush.msra.mxu0 %v2507_v25 }
 0x387   : > { %v1927_v8 = vmax.f32 %v1880_v6, %v1923_v7  ;;  %v883_v6 = vld [vmem:[%s4294_s11 + $0x20] sm:$0xff]  ;;  %v882_v7 = vld [vmem:[%s4294_s11 + $0x18] sm:$0xff] }
 0x388   : > { %2081 = vmatpush.msra.mxu0 %v2506_v31  ;;  %2154 = vmatpush.msrb.mxu2 %v883_v6  ;;  %v896_v31 = vld [vmem:[%s4296_s13 + $0x8] sm:$0xff] }
 0x389   : > { %2629 = vmatmul.msk.f32.vlgmr.msra.gmra.mxu3 %vm1928_vm10, %v1927_v8  ;;  %2628 = vmatmul.msk.f32.vlgmr.msrb.gmra.mxu0 %vm1928_vm10, %v1927_v8  ;;  %v881_v8 = vld [vmem:[%s4294_s11 + $0x10] sm:$0xff] }
 0x38a   : > { %2122 = vmatpush.msra.mxu3 %v2533_v16  ;;  %2082 = vmatpush.msra.mxu0 %v2505_v34  ;;  %v899_v16 = vld [vmem:[%s4296_s13 + $0x20] sm:$0xff] }
 0x38b   : > { %2155 = vmatpush.msrb.mxu2 %v882_v7 }
 0x38c   : > { %2123 = vmatpush.msra.mxu3 %v2532_v21  ;;  %2083 = vmatpush.msra.mxu0 %v2504_v37  ;;  %v906_v37 = vld [vmem:[%s4297_s14] sm:$0x1] }
 0x38d   : > { %2156 = vmatpush.msrb.mxu2 %v881_v8 }
 0x38e   : > { %2124 = vmatpush.msra.mxu3 %v2531_v26  ;;  %2636 = vmatpush.msk.msrb.mxu0 %vm1220_vm4, %v905_v11 }
 0x38f   : > { %2157 = vmatpush.msrb.mxu2 %v880_v9 }
 0x390   : > { %2125 = vmatpush.msra.mxu3 %v2530_v24  ;;  %2176 = vmatpush.msrb.mxu0 %v904_v12 }
 0x391   : > { %2158 = vmatpush.msrb.mxu2 %v879_v10 }
 0x392   : > { %2126 = vmatpush.msra.mxu3 %v2529_v29  ;;  %2177 = vmatpush.msrb.mxu0 %v903_v4  ;;  %v897_v29 = vld [vmem:[%s4296_s13 + $0x10] sm:$0xff] }
 0x394   : > { %2127 = vmatpush.msra.mxu3 %v2528_v33  ;;  %2178 = vmatpush.msrb.mxu0 %v902_v13  ;;  %v894_v33 = vld [vmem:[%s4295_s12] sm:$0x1] }
 0x396   : > { %2128 = vmatpush.msra.mxu3 %v2527_v36  ;;  %2179 = vmatpush.msrb.mxu0 %v901_v14 }
 0x398   : > { %2129 = vmatpush.msra.mxu3 %v2526_v41  ;;  %2180 = vmatpush.msrb.mxu0 %v900_v15 }
 0x39a   : > { %2130 = vmatpush.msra.mxu3 %v2525_v43  ;;  %2181 = vmatpush.msrb.mxu0 %v899_v16 }
 0x39c   : > { %2131 = vmatpush.msra.mxu3 %v2524_v45  ;;  %2182 = vmatpush.msrb.mxu0 %v898_v17 }
 0x39e   : > { %2183 = vmatpush.msrb.mxu0 %v897_v29 }
 0x3a0   : > { %2184 = vmatpush.msrb.mxu0 %v896_v31 }
 0x3a2   : > { %2185 = vmatpush.msrb.mxu0 %v895_v32 }
 0x3f6   : > { %v1949_v50 = vpop.f32.mrf.mxu0 }
 0x3fc   : > { %v1989_v55 = vpop.f32.mrf.mxu2 }
 0x406   : > { %v1969_v54 = vpop.f32.mrf.mxu0 }
 0x407   : > { %v1970_v38 = vadd.f32 %v1969_v54, %v1949_v50 }
 0x40c   : > { %v2009_v56 = vpop.f32.mrf.mxu3 }
 0x40d   : > { %v2010_v39 = vadd.f32 %v2009_v56, %v1989_v55 }
 0x40f   : > { %v2012_v58 = vmax.f32 %v1970_v38, %v2010_v39 }
 0x411   : > { %v2016_v59 = vadd.f32 %v2681_v57, %v2012_v58 }
 0x413   : > { %v2017_v60 = vmax.f32 %v2016_v59, 0.0 }
 0x415   : > { %2631 = vmatmul.msk.f32.vlgmr.msrb.gmra.mxu3 %vm2020_vm11, %v2017_v60  ;;  %v2019_v61 = vrot.slane %v2017_v60, 1  ;;  %v2065_v62 = vrot.slane %v2017_v60, 2  ;;  %v2113_v63 = vrot.slane %v2017_v60, 4  ;;  %v2089_v0 = vrot.slane %v2017_v60, 3 }
 0x417   : > { %2630 = vmatmul.msk.f32.vlgmr.msra.gmra.mxu1 %vm2020_vm11, %v2019_v61  ;;  %2632 = vmatmul.msk.f32.vlgmr.msra.gmra.mxu0 %vm2020_vm11, %v2065_v62 }
 0x41d   : > { %2634 = vmatmul.msk.f32.vlgmr.msra.gmra.mxu3 %vm2020_vm11, %v2113_v63 }
 0x41f   : > { %2633 = vmatmul.msk.f32.vlgmr.msrb.gmra.mxu1 %vm2020_vm11, %v2089_v0 }
 0x494   : > { %v2040_v18 = vpop.f32.mrf.mxu1  ;;  %v2085_v21 = vpop.f32.mrf.mxu0 }
 0x498   : > { %v2062_v19 = vpop.f32.mrf.mxu3 }
 0x499   : > { %v2063_v20 = vadd.f32 %v2062_v19, %v2040_v18 }
 0x49b   : > { %v2088_v22 = vadd.f32 %v2085_v21, %v2063_v20 }
 0x49c   : > { %v2109_v23 = vpop.f32.mrf.mxu1 }
 0x49d   : > { %v2112_v26 = vadd.f32 %v2109_v23, %v2088_v22 }
 0x4a0   : > { %v2133_v30 = vpop.f32.mrf.mxu3 }
 0x4a1   : > { %v2136_v24 = vadd.f32 %v2133_v30, %v2112_v26 }
 0x4a3   : > { %v2137_v25 = vadd.f32 %v2136_v24, %v878_v27 }
 0x4a5   : > { %v2138_v28 = vmax.f32 %v2137_v25, 0.0 }
 0x4a7   : > { %2635 = vmatmul.msk.f32.vlgmr.msrb.gmra.mxu2 %vm2139_vm12, %v2138_v28 }
 0x52a   : > { %v2160_v34 = vpop.f32.mrf.mxu2 }
 0x52b   : > { %v2161_v35 = vadd.f32 %v2160_v34, %v894_v33 }
 0x52d   : > { %v2163_v36 = vmax.f32 %v2161_v35, 0.0 }
 0x52f   : > { %2637 = vmatmul.msk.f32.vlgmr.msrb.gmra.mxu0 %vm1530_vm7, %v2163_v36 }
 0x5ac   : > { %v2187_v40 = vpop.f32.mrf.mxu0 }
 0x5ad   : > { %v2188_v41 = vadd.f32 %v2187_v40, %v906_v37 }
 0x5af   : > { %2191 = vst.msk [vmem:[%s486_s27] sm:$0x1] %vm2190_vm13, %v2188_v41 }
 0x5b0   : > { %2709 = shalt.err (!%p2706_p3)
}
 0x5b1   : > { %2641 = dma.vmem_to_hbm [thread:$0]  (%p2864_p5), %s2204_s24, 16, %s2206_s29, %s2193_s30  }
 0x5b2 PF: > { %s4315_s17 = sld [smem:[#allocation7_spill]] }
 0x5b3   : > { %s4316_s26 = sld [smem:[#allocation5_spill]] }
 0x5b8   : > { %p2647_p4 = scmp.ge.s32.totalorder %s4315_s17, 2 }
 0x5b9   : > { %s2217_s0 = sand.u32 1, %s4316_s26  }
 0x5ba   : > { %p2644_p7 = pnand %p2647_p4, %p2868_p6  ;;  %s2218_s22 = scalar_lea.sflag [#allocation3], %s2217_s0 }
 0x5bc   : > { %p2645_p8 = pneg %p2644_p7 }
 0x5be   : > { %2727 = dma.done.wait (%p2645_p8), %s2218_s22, 16  }
 0x5bf   : > { %2729 = vsyncadd (%p2645_p8), %s2218_s22, 4294967280  ;;  %s4318_s21 = sld [smem:[#allocation8_spill]]  ;;  %s4321_s18 = smov %s2736_s19 }
 0x5c0   : > { %s4319_s16 = sld [smem:[#allocation6_spill]] }
 0x5c1   : > { %s4320_s20 = sld [smem:[#allocation9_spill]] }
 0x5c5   : > { %p25_p9 = scmp.ge.s32.totalorder %s4318_s21, 4  }
 0x5c6   : > { %s4322_s19 = smov %s4319_s16 }
 0x5c7   :  { %27 = sbr.rel (!%p25_p9) target bundleno = 5 (0x5), region = 131 }
 0x5cc   :  { %2223 = vsyncpa [#allocation3], 1 }
 0x5cd   :  { %2225 = vsyncpa [#allocation3 + $0x1], 1 }

</bundles_post_ra>
